<compile_context>
chip_gen: v6e
topology: v6e:2x2x1
jax: 0.10.0
libtpu: 0.0.40
codegen_flags: <defaults>
</compile_context>

<pallas_src>
import functools

import jax
import jax.numpy as jnp
from jax import lax
from jax.experimental import pallas as pl
from jax.experimental.pallas import tpu as pltpu


_CHUNK = 256  # rows per inner step; keeps the f32 working set in vregs/VMEM small.


def complex_score_kernel(h_ref, r_ref, t_ref, o_ref, *, chunk):
    """One edge tile: o_ref[0, e] = Re(<h_e, r_e, conj(t_e)>)."""
    d2 = h_ref.shape[-1] // 2
    n_chunks = h_ref.shape[0] // chunk

    def body(c, carry):
        start = pl.multiple_of(c * chunk, chunk)
        rows = pl.ds(start, chunk)
        # Upcast so products + reduction accumulate in f32 even for bf16 inputs.
        h = h_ref[rows, :].astype(jnp.float32)
        r = r_ref[rows, :].astype(jnp.float32)
        t = t_ref[rows, :].astype(jnp.float32)
        rh, ih = h[:, :d2], h[:, d2:]
        rr, ir = r[:, :d2], r[:, d2:]
        rt, it = t[:, :d2], t[:, d2:]
        # Factored ComplEx score: 6 mul + 3 add per element.
        score = rr * (rh * rt + ih * it) + ir * (rh * it - ih * rt)
        s = jnp.sum(score, axis=-1)
        # Lane-dense store of this chunk's scores (chunk is a 128 multiple).
        o_ref[:, pl.ds(start, chunk)] = s.reshape(1, chunk).astype(o_ref.dtype)
        return carry

    lax.fori_loop(0, n_chunks, body, 0, unroll=True)


def _round_up(x, m):
    return ((x + m - 1) // m) * m


def _vmem_limit_bytes():
    try:
        cap = pltpu.get_tpu_info().vmem_capacity_bytes
    except Exception:
        cap = 64 * 1024 * 1024  # conservative fallback (v7x-sized VMEM)
    return int(cap) * 3 // 4     # 48 MiB on v7x, 96 MiB on v5e/v6e


def _choose_chunk(D, vmem_limit):
    """Keep the in-kernel f32 working set (~8 chunk x D arrays) well under VMEM."""
    chunk = _CHUNK
    while chunk > 128 and 8 * chunk * D * 4 > vmem_limit // 3:
        chunk //= 2
    return chunk


def _choose_tile_e(E, D, itemsize, vmem_limit, chunk):
    """Largest edge tile whose DMA blocks + in-kernel temps fit the VMEM budget."""
    temp_bytes = 8 * chunk * D * 4                 # f32 copies of h/r/t + products
    per_row = 3 * 2 * D * itemsize                 # 3 inputs, double-buffered blocks
    budget = max(vmem_limit - temp_bytes - (2 << 20), chunk * per_row)
    cap = max((budget // per_row) // chunk * chunk, chunk)
    cap = min(cap, 4096)
    tile = min(cap, _round_up(E, chunk))
    # v7x has 2 TensorCores; keep >= 2 grid steps for medium-sized E so the
    # "parallel" edge axis can actually be split across cores.
    if E > 2 * chunk and pl.cdiv(E, tile) < 2:
        tile = _round_up(pl.cdiv(E, 2), chunk)
    return tile


def complex_score(head_emb, rel_emb, tail_emb):
    """Per-edge ComplEx score. Inputs: [E, D] each (f32 or bf16). Output: [E] f32."""
    E, D = head_emb.shape
    assert D % 2 == 0, "hidden dim must be even (real/imag halves)"
    assert rel_emb.shape == (E, D) and tail_emb.shape == (E, D)
    # Perf note: (D // 2) % 128 == 0 keeps the real/imag half-slices lane-aligned
    # (free vreg-column views); other even D remain correct, just slower.

    itemsize = jnp.dtype(head_emb.dtype).itemsize
    vmem_limit = _vmem_limit_bytes()
    chunk = _choose_chunk(D, vmem_limit)
    tile_e = _choose_tile_e(E, D, itemsize, vmem_limit, chunk)

    # No full-array padding.  The grid is ragged: the trailing block may read
    # past E and those (undefined) rows are discarded by the [:E] slice below.
    # Only when everything fits in a single tile do we pad the few missing
    # rows (< one tile) so block_shape never exceeds the array shape.
    if E < tile_e:
        pad = tile_e - E
        head_emb = jnp.pad(head_emb, ((0, pad), (0, 0)))
        rel_emb = jnp.pad(rel_emb, ((0, pad), (0, 0)))
        tail_emb = jnp.pad(tail_emb, ((0, pad), (0, 0)))

    num_tiles = pl.cdiv(E, tile_e)

    cost = pl.CostEstimate(
        flops=5 * E * D,                     # ~10 VPU ops per (row, D/2) element
        transcendentals=0,
        bytes_accessed=3 * E * D * itemsize + E * 4,
    )

    out = pl.pallas_call(
        functools.partial(complex_score_kernel, chunk=chunk),
        # Lane-dense output: one (1, tile_e) row of scores per grid step.
        out_shape=jax.ShapeDtypeStruct((1, num_tiles * tile_e), jnp.float32),
        grid_spec=pl.GridSpec(
            grid=(num_tiles,),
            in_specs=[
                pl.BlockSpec((tile_e, D), lambda i: (i, 0)),
                pl.BlockSpec((tile_e, D), lambda i: (i, 0)),
                pl.BlockSpec((tile_e, D), lambda i: (i, 0)),
            ],
            out_specs=pl.BlockSpec((1, tile_e), lambda i: (0, i)),
        ),
        compiler_params=pltpu.CompilerParams(
            dimension_semantics=("parallel",),
            vmem_limit_bytes=int(vmem_limit),
        ),
        cost_estimate=cost,
    )(head_emb, rel_emb, tail_emb)

    return out[0, :E]


def complex_score_ref(head_emb, rel_emb, tail_emb):
    """Pure-JAX reference mirroring the PyTorch edge_func (4-term form)."""
    d2 = head_emb.shape[-1] // 2
    h = head_emb.astype(jnp.float32)
    r = rel_emb.astype(jnp.float32)
    t = tail_emb.astype(jnp.float32)
    rh, ih = h[:, :d2], h[:, d2:]
    rr, ir = r[:, :d2], r[:, d2:]
    rt, it = t[:, :d2], t[:, d2:]
    score = rh * rt * rr + ih * it * rr + rh * it * ir - ih * rt * ir
    return jnp.sum(score, axis=-1)


if __name__ == "__main__":
    # ComplExScore has no learnable parameters; forward() == per-edge edge_func.
    # TODO(synk): infer()/create_neg() (all-pairs / negative-sample bmm scoring)
    # are separate entry points, not forward(); only edge_func is implemented.
    _ = jax.random.PRNGKey(0)

    def _check(E, D, dtype, seed):
        ks = jax.random.split(jax.random.PRNGKey(seed), 3)
        h = jax.random.normal(ks[0], (E, D), dtype=jnp.float32).astype(dtype)
        r = jax.random.normal(ks[1], (E, D), dtype=jnp.float32).astype(dtype)
        t = jax.random.normal(ks[2], (E, D), dtype=jnp.float32).astype(dtype)
        out = jax.block_until_ready(complex_score(h, r, t))
        ref = complex_score_ref(h, r, t)
        assert out.shape == (E,), (out.shape, E)
        assert jnp.allclose(out, ref, atol=1e-3, rtol=1e-3), (
            f"Pallas kernel mismatch vs reference (E={E}, D={D}, dtype={dtype})")

    _check(16, 256, jnp.float32, 0)     # tiny E: single (lightly padded) tile
    _check(600, 256, jnp.float32, 1)    # multi-tile grid with ragged last block
    _check(600, 256, jnp.bfloat16, 2)   # bf16 streaming with f32 accumulation

    print("KERNEL_OK")
</pallas_src>

<mosaic_0001>
module attributes {stable_mosaic.version = 11 : i64} {
  func.func @complex_score_kernel(%arg0: i32, %arg1: memref<256x256xf32, #tpu.memory_space<vmem>>, %arg2: memref<256x256xf32, #tpu.memory_space<vmem>>, %arg3: memref<256x256xf32, #tpu.memory_space<vmem>>, %arg4: memref<1x256xf32, #tpu.memory_space<vmem>>) attributes {dimension_semantics = [#tpu.dimension_semantics<parallel>], iteration_bounds = array<i64: 1>, scalar_prefetch = 0 : i64, scratch_operands = 0 : i64, tpu.core_type = #tpu.core_type<tc>, window_params = [{transform_indices = @transform_0, window_bounds = array<i64: 256, 256>}, {transform_indices = @transform_1, window_bounds = array<i64: 256, 256>}, {transform_indices = @transform_2, window_bounds = array<i64: 256, 256>}, {transform_indices = @transform_3, window_bounds = array<i64: 1, 256>}]} {
    %c0_i32 = arith.constant 0 : i32
    %c256_i32 = arith.constant 256 : i32
    %0 = arith.muli %c0_i32, %c256_i32 : i32
    %1 = tpu.assume_multiple %0, 256 : i32
    %2 = arith.index_cast %1 : i32 to index
    %c0 = arith.constant 0 : index
    %3 = vector.load %arg1[%2, %c0] : memref<256x256xf32, #tpu.memory_space<vmem>>, vector<256x256xf32>
    %4 = arith.index_cast %1 : i32 to index
    %c0_0 = arith.constant 0 : index
    %5 = vector.load %arg2[%4, %c0_0] : memref<256x256xf32, #tpu.memory_space<vmem>>, vector<256x256xf32>
    %6 = arith.index_cast %1 : i32 to index
    %c0_1 = arith.constant 0 : index
    %7 = vector.load %arg3[%6, %c0_1] : memref<256x256xf32, #tpu.memory_space<vmem>>, vector<256x256xf32>
    %8 = vector.extract_strided_slice %3 {offsets = [0, 0], sizes = [256, 128], strides = [1, 1]} : vector<256x256xf32> to vector<256x128xf32>
    %9 = vector.extract_strided_slice %3 {offsets = [0, 128], sizes = [256, 128], strides = [1, 1]} : vector<256x256xf32> to vector<256x128xf32>
    %10 = vector.extract_strided_slice %5 {offsets = [0, 0], sizes = [256, 128], strides = [1, 1]} : vector<256x256xf32> to vector<256x128xf32>
    %11 = vector.extract_strided_slice %5 {offsets = [0, 128], sizes = [256, 128], strides = [1, 1]} : vector<256x256xf32> to vector<256x128xf32>
    %12 = vector.extract_strided_slice %7 {offsets = [0, 0], sizes = [256, 128], strides = [1, 1]} : vector<256x256xf32> to vector<256x128xf32>
    %13 = vector.extract_strided_slice %7 {offsets = [0, 128], sizes = [256, 128], strides = [1, 1]} : vector<256x256xf32> to vector<256x128xf32>
    %14 = arith.mulf %8, %12 : vector<256x128xf32>
    %15 = arith.mulf %9, %13 : vector<256x128xf32>
    %16 = arith.addf %14, %15 : vector<256x128xf32>
    %17 = arith.mulf %10, %16 : vector<256x128xf32>
    %18 = arith.mulf %8, %13 : vector<256x128xf32>
    %19 = arith.mulf %9, %12 : vector<256x128xf32>
    %20 = arith.subf %18, %19 : vector<256x128xf32>
    %21 = arith.mulf %11, %20 : vector<256x128xf32>
    %22 = arith.addf %17, %21 : vector<256x128xf32>
    %cst = arith.constant dense<0.000000e+00> : vector<256xf32>
    %23 = vector.multi_reduction <add>, %22, %cst [1] : vector<256x128xf32> to vector<256xf32>
    %24 = vector.shape_cast %23 : vector<256xf32> to vector<1x256xf32>
    %c0_2 = arith.constant 0 : index
    %25 = arith.index_cast %1 : i32 to index
    %26 = vector.load %arg4[%c0_2, %25] : memref<1x256xf32, #tpu.memory_space<vmem>>, vector<1x256xf32>
    tpu.vector_store %arg4[%c0_2, %25], %24 {strides = array<i32>} : memref<1x256xf32, #tpu.memory_space<vmem>>, vector<1x256xf32>,
    %c1_i32 = arith.constant 1 : i32
    return
  }
  func.func @transform_0(%arg0: i32) -> (i32, i32) {
    %c0_i32 = arith.constant 0 : i32
    %c0_i32_0 = arith.constant 0 : i32
    return %arg0, %c0_i32 : i32, i32
  }
  func.func @transform_1(%arg0: i32) -> (i32, i32) {
    %c0_i32 = arith.constant 0 : i32
    %c0_i32_0 = arith.constant 0 : i32
    return %arg0, %c0_i32 : i32, i32
  }
  func.func @transform_2(%arg0: i32) -> (i32, i32) {
    %c0_i32 = arith.constant 0 : i32
    %c0_i32_0 = arith.constant 0 : i32
    return %arg0, %c0_i32 : i32, i32
  }
  func.func @transform_3(%arg0: i32) -> (i32, i32) {
    %c0_i32 = arith.constant 0 : i32
    %c0_i32_0 = arith.constant 0 : i32
    return %c0_i32, %arg0 : i32, i32
  }
}

</mosaic_0001>

<bundles_post_ra>
// kernel: tpu_custom_call.1
= control target key start
LH: loop header
LB: loop body
LE: loop exit
PB: predicated region body
PF: predicated region fallthrough
CT: control target
= control target key end

     0   :  { %8 = vsyncpa [#allocation3], 0  ;;  %s4374_s0 = inlined_call_operand.hbm [shape: f32[256,256], index: 0, kind: input, shape index: {}]   ;;  %s4375_s1 = inlined_call_operand.hbm [shape: f32[256,256], index: 1, kind: input, shape index: {}]   ;;  %s4376_s2 = inlined_call_operand.hbm [shape: f32[256,256], index: 2, kind: input, shape index: {}]   ;;  %s4377_s3 = inlined_call_operand.hbm [shape: f32[1,256], index: 3, kind: output, shape index: {}]  }
   0x1   :  { %9 = vsyncpa [#allocation6], 0 }
   0x2   :  { %10 = vsyncpa [#allocation4], 0  ;;  %s3650_s12 = smov [#allocation5]   ;;  %s3651_s14 = smov [#allocation2]  }
   0x3   :  { %s28_s13 = sshll.u32 %s3650_s12, 4  ;;  %s16_s15 = sshll.u32 %s3651_s14, 4  ;;  %s29_s13 = int_to_ptr.vmem [resolvable:$true] %s28_s13  ;;  %s17_s15 = int_to_ptr.vmem [resolvable:$true] %s16_s15 }
   0x4   :  { %s3572_s16 = scalar_lea.vmem %s29_s13, 8192  ;;  %p3577_p1 = scmp.lt.s32.totalorder %s29_s13, %s29_s13 }
   0x5   :  { %p3573_p0 = scmp.ne.s32.totalorder %s29_s13, %s3572_s16  ;;  %p3578_p2 = scmp.lt.s32.totalorder %s3572_s16, %s3572_s16 }
   0x7   :  { %p3579_p3 = por %p3578_p2, %p3577_p1 }
   0x9   :  { %p3580_p4 = pnand %p3579_p3, %p3573_p0 }
   0xb   :  { %3583 = shalt.err (!%p3580_p4)
}
   0xc   :  { %s3652_s17 = smov 256   ;;  %s3653_s18 = smov 16  }
   0xd   :  { %34 = dma.hbm_to_vmem [thread:$0]  %s4375_s1, 8192, %s29_s13, [#allocation6], %s3652_s17, %s3652_s17, %s3653_s18  }
   0xe   :  { %s3592_s21 = scalar_lea.vmem %s17_s15, 8192  ;;  %p3597_p6 = scmp.lt.s32.totalorder %s17_s15, %s17_s15 }
   0xf   :  { %p3593_p5 = scmp.ne.s32.totalorder %s17_s15, %s3592_s21  ;;  %p3598_p7 = scmp.lt.s32.totalorder %s3592_s21, %s3592_s21 }
  0x11   :  { %p3599_p8 = por %p3598_p7, %p3597_p6 }
  0x13   :  { %p3600_p9 = pnand %p3599_p8, %p3593_p5 }
  0x15   :  { %3603 = shalt.err (!%p3600_p9)
}
  0x16   :  { %22 = dma.hbm_to_vmem [thread:$0]  %s4374_s0, 8192, %s17_s15, [#allocation3], %s3652_s17, %s3652_s17, %s3653_s18  }
  0x17   :  { %s3654_s24 = smov [#allocation7]  }
  0x18   :  { %s40_s25 = sshll.u32 %s3654_s24, 4  ;;  %s41_s25 = int_to_ptr.vmem [resolvable:$true] %s40_s25 }
  0x19   :  { %s3612_s26 = scalar_lea.vmem %s41_s25, 8192  ;;  %p3617_p11 = scmp.lt.s32.totalorder %s41_s25, %s41_s25 }
  0x1a   :  { %p3613_p10 = scmp.ne.s32.totalorder %s41_s25, %s3612_s26  ;;  %p3618_p12 = scmp.lt.s32.totalorder %s3612_s26, %s3612_s26 }
  0x1c   :  { %p3619_p13 = por %p3618_p12, %p3617_p11 }
  0x1e   :  { %p3620_p0 = pnand %p3619_p13, %p3613_p10 }
  0x20   :  { %3623 = shalt.err (!%p3620_p0)
}
  0x21   :  { %46 = dma.hbm_to_vmem [thread:$0]  %s4376_s2, 8192, %s41_s25, [#allocation6], %s3652_s17, %s3652_s17, %s3653_s18  }
  0x22   :  { %3644 = dma.done.wait [#allocation3], 8192  }
  0x23   :  { %3645 = vsyncadd [#allocation3], 4294959104 }
  0x24   :  { %3646 = dma.done.wait [#allocation6], 16384  }
  0x25   :  { %3647 = vsyncadd [#allocation6], 4294950912  ;;  %v59_v0 = vld [vmem:[#allocation2] sm:$0xff]  ;;  %v60_v1 = vld [vmem:[#allocation2 + $0x8] sm:$0xff]  ;;  %vm3338_vm0 = vcmask 130112   ;;  %vm3345_vm1 = vcmask 195712  }
  0x26   :  { %v191_v2 = vld [vmem:[#allocation7] sm:$0xff]  ;;  %v192_v3 = vld [vmem:[#allocation7 + $0x8] sm:$0xff]  ;;  %v61_v18 = vld [vmem:[#allocation2 + $0x10] sm:$0xff]  ;;  %vm3352_vm2 = vcmask 261312   ;;  %vm3359_vm3 = vcmask 326912   ;;  %vm3366_vm4 = vcmask 392512  }
  0x27   :  { %v125_v4 = vld [vmem:[#allocation5] sm:$0xff]  ;;  %v255_v5 = vmul.f32 %v191_v2, %v59_v0  ;;  %v287_v6 = vmul.f32 %v192_v3, %v60_v1  ;;  %v383_v7 = vmul.f32 %v192_v3, %v59_v0  ;;  %v415_v8 = vmul.f32 %v191_v2, %v60_v1  ;;  %v64_v10 = vld [vmem:[#allocation2 + $0x28] sm:$0xff]  ;;  %v62_v19 = vld [vmem:[#allocation2 + $0x18] sm:$0xff]  ;;  %s3657_s0 = smov [#allocation8]  }
  0x28   :  { %v63_v9 = vld [vmem:[#allocation2 + $0x20] sm:$0xff]  ;;  %v126_v11 = vld [vmem:[#allocation5 + $0x8] sm:$0xff]  ;;  %v193_v23 = vld [vmem:[#allocation7 + $0x10] sm:$0xff]  ;;  %vm3373_vm5 = vcmask 458112   ;;  %vm3380_vm6 = vcmask 523712   ;;  %vm3387_vm7 = vcmask 589312  }
  0x29   :  { %v195_v12 = vld [vmem:[#allocation7 + $0x20] sm:$0xff]  ;;  %v196_v13 = vld [vmem:[#allocation7 + $0x28] sm:$0xff]  ;;  %v319_v14 = vadd.f32 %v287_v6, %v255_v5  ;;  %v447_v15 = vsub.f32 %v383_v7, %v415_v8  ;;  %v194_v24 = vld [vmem:[#allocation7 + $0x18] sm:$0xff]  ;;  %v256_v29 = vmul.f32 %v193_v23, %v61_v18  ;;  %v416_v36 = vmul.f32 %v193_v23, %v62_v19  ;;  %s3544_s2 = sshll.u32 %s3657_s0, 4  ;;  %s3545_s2 = int_to_ptr.vmem [resolvable:$true] %s3544_s2 }
  0x2a   :  { %v257_v16 = vmul.f32 %v195_v12, %v63_v9  ;;  %v289_v17 = vmul.f32 %v196_v13, %v64_v10  ;;  %v129_v20 = vld [vmem:[#allocation5 + $0x20] sm:$0xff]  ;;  %v385_v21 = vmul.f32 %v196_v13, %v63_v9  ;;  %v417_v22 = vmul.f32 %v195_v12, %v64_v10  ;;  %v130_v27 = vld [vmem:[#allocation5 + $0x28] sm:$0xff]  ;;  %v65_v30 = vld [vmem:[#allocation2 + $0x30] sm:$0xff]  ;;  %s3624_s28 = scalar_lea.vmem %s3545_s2, 32  ;;  %p3629_p2 = scmp.lt.s32.totalorder %s3545_s2, %s3545_s2 }
  0x2b   :  { %v351_v25 = vmul.f32 %v319_v14, %v125_v4  ;;  %v479_v26 = vmul.f32 %v447_v15, %v126_v11  ;;  %v66_v31 = vld [vmem:[#allocation2 + $0x38] sm:$0xff]  ;;  %v127_v33 = vld [vmem:[#allocation5 + $0x10] sm:$0xff]  ;;  %v288_v34 = vmul.f32 %v194_v24, %v62_v19  ;;  %v384_v35 = vmul.f32 %v194_v24, %v61_v18  ;;  %v67_v44 = vld [vmem:[#allocation2 + $0x40] sm:$0xff]  ;;  %p3625_p1 = scmp.ne.s32.totalorder %s3545_s2, %s3624_s28  ;;  %p3630_p3 = scmp.lt.s32.totalorder %s3624_s28, %s3624_s28 }
  0x2c   :  { %v321_v28 = vadd.f32 %v289_v17, %v257_v16  ;;  %v449_v32 = vsub.f32 %v385_v21, %v417_v22  ;;  %v197_v37 = vld [vmem:[#allocation7 + $0x30] sm:$0xff]  ;;  %v198_v38 = vld [vmem:[#allocation7 + $0x38] sm:$0xff]  ;;  %v68_v45 = vld [vmem:[#allocation2 + $0x48] sm:$0xff]  ;;  %vm3394_vm8 = vcmask 654912   ;;  %vm3401_vm9 = vcmask 720512  }
  0x2d   :  { %v511_v39 = vadd.f32 %v479_v26, %v351_v25  ;;  %v128_v41 = vld [vmem:[#allocation5 + $0x18] sm:$0xff]  ;;  %v258_v42 = vmul.f32 %v197_v37, %v65_v30  ;;  %v290_v43 = vmul.f32 %v198_v38, %v66_v31  ;;  %v320_v47 = vadd.f32 %v288_v34, %v256_v29  ;;  %v131_v49 = vld [vmem:[#allocation5 + $0x30] sm:$0xff]  ;;  %v199_v51 = vld [vmem:[#allocation7 + $0x40] sm:$0xff]  ;;  %p3631_p4 = por %p3630_p3, %p3629_p2 }
  0x2e   :  { %v353_v40 = vmul.f32 %v321_v28, %v129_v20  ;;  %v481_v46 = vmul.f32 %v449_v32, %v130_v27  ;;  %v448_v48 = vsub.f32 %v384_v35, %v416_v36  ;;  %v386_v50 = vmul.f32 %v198_v38, %v65_v30  ;;  %v200_v52 = vld [vmem:[#allocation7 + $0x48] sm:$0xff]  ;;  %v132_v53 = vld [vmem:[#allocation5 + $0x38] sm:$0xff]  ;;  %v69_v58 = vld [vmem:[#allocation2 + $0x50] sm:$0xff] }
  0x2f   :  { %543 = vadd.xlane.f32.xlu0 %v511_v39  ;;  %v322_v54 = vadd.f32 %v290_v43, %v258_v42  ;;  %v418_v55 = vmul.f32 %v197_v37, %v66_v31  ;;  %v259_v56 = vmul.f32 %v199_v51, %v67_v44  ;;  %v291_v57 = vmul.f32 %v200_v52, %v68_v45  ;;  %v70_v59 = vld [vmem:[#allocation2 + $0x58] sm:$0xff]  ;;  %v133_v63 = vld [vmem:[#allocation5 + $0x40] sm:$0xff]  ;;  %v201_v1 = vld [vmem:[#allocation7 + $0x50] sm:$0xff]  ;;  %p3632_p5 = pnand %p3631_p4, %p3625_p1 }
  0x30   :  { %v513_v60 = vadd.f32 %v481_v46, %v353_v40  ;;  %v352_v61 = vmul.f32 %v320_v47, %v127_v33  ;;  %v480_v62 = vmul.f32 %v448_v48, %v128_v41  ;;  %v387_v0 = vmul.f32 %v200_v52, %v67_v44  ;;  %v202_v2 = vld [vmem:[#allocation7 + $0x58] sm:$0xff]  ;;  %v71_v7 = vld [vmem:[#allocation2 + $0x60] sm:$0xff]  ;;  %v72_v8 = vld [vmem:[#allocation2 + $0x68] sm:$0xff] }
  0x31   :  { %v354_v3 = vmul.f32 %v322_v54, %v131_v49  ;;  %v450_v4 = vsub.f32 %v386_v50, %v418_v55  ;;  %v323_v5 = vadd.f32 %v291_v57, %v259_v56  ;;  %v419_v6 = vmul.f32 %v199_v51, %v68_v45  ;;  %v134_v10 = vld [vmem:[#allocation5 + $0x48] sm:$0xff]  ;;  %v203_v14 = vld [vmem:[#allocation7 + $0x60] sm:$0xff]  ;;  %v135_v19 = vld [vmem:[#allocation5 + $0x50] sm:$0xff] }
  0x32   :  { %547 = vadd.xlane.f32.xlu1 %v513_v60  ;;  %v512_v9 = vadd.f32 %v480_v62, %v352_v61  ;;  %v260_v11 = vmul.f32 %v201_v1, %v69_v58  ;;  %v292_v12 = vmul.f32 %v202_v2, %v70_v59  ;;  %v388_v13 = vmul.f32 %v202_v2, %v69_v58  ;;  %v204_v15 = vld [vmem:[#allocation7 + $0x68] sm:$0xff]  ;;  %v73_v21 = vld [vmem:[#allocation2 + $0x70] sm:$0xff]  ;;  %v74_v22 = vld [vmem:[#allocation2 + $0x78] sm:$0xff] }
  0x33   :  { %v482_v16 = vmul.f32 %v450_v4, %v132_v53  ;;  %v355_v17 = vmul.f32 %v323_v5, %v133_v63  ;;  %v451_v18 = vsub.f32 %v387_v0, %v419_v6  ;;  %v420_v20 = vmul.f32 %v201_v1, %v70_v59  ;;  %v136_v23 = vld [vmem:[#allocation5 + $0x58] sm:$0xff]  ;;  %v205_v28 = vld [vmem:[#allocation7 + $0x70] sm:$0xff]  ;;  %v137_v33 = vld [vmem:[#allocation5 + $0x60] sm:$0xff] }
  0x34   :  { %545 = vadd.xlane.f32.xlu0 %v512_v9  ;;  %v324_v24 = vadd.f32 %v292_v12, %v260_v11  ;;  %v261_v25 = vmul.f32 %v203_v14, %v71_v7  ;;  %v293_v26 = vmul.f32 %v204_v15, %v72_v8  ;;  %v389_v27 = vmul.f32 %v204_v15, %v71_v7  ;;  %v206_v29 = vld [vmem:[#allocation7 + $0x78] sm:$0xff]  ;;  %v138_v34 = vld [vmem:[#allocation5 + $0x68] sm:$0xff]  ;;  %v75_v36 = vld [vmem:[#allocation2 + $0x80] sm:$0xff] }
  0x35   :  { %v514_v30 = vadd.f32 %v482_v16, %v354_v3  ;;  %v483_v31 = vmul.f32 %v451_v18, %v134_v10  ;;  %v452_v32 = vsub.f32 %v388_v13, %v420_v20  ;;  %v421_v35 = vmul.f32 %v203_v14, %v72_v8  ;;  %v76_v41 = vld [vmem:[#allocation2 + $0x88] sm:$0xff]  ;;  %v207_v42 = vld [vmem:[#allocation7 + $0x80] sm:$0xff]  ;;  %v139_v47 = vld [vmem:[#allocation5 + $0x70] sm:$0xff] }
  0x36   :  { %v356_v37 = vmul.f32 %v324_v24, %v135_v19  ;;  %v325_v38 = vadd.f32 %v293_v26, %v261_v25  ;;  %v262_v39 = vmul.f32 %v205_v28, %v73_v21  ;;  %v294_v40 = vmul.f32 %v206_v29, %v74_v22  ;;  %v208_v43 = vld [vmem:[#allocation7 + $0x88] sm:$0xff]  ;;  %v77_v49 = vld [vmem:[#allocation2 + $0x90] sm:$0xff]  ;;  %v78_v54 = vld [vmem:[#allocation2 + $0x98] sm:$0xff] }
  0x37   :  { %549 = vadd.xlane.f32.xlu1 %v514_v30  ;;  %v515_v44 = vadd.f32 %v483_v31, %v355_v17  ;;  %v484_v45 = vmul.f32 %v452_v32, %v136_v23  ;;  %v453_v46 = vsub.f32 %v389_v27, %v421_v35  ;;  %v390_v48 = vmul.f32 %v206_v29, %v73_v21  ;;  %v209_v55 = vld [vmem:[#allocation7 + $0x90] sm:$0xff]  ;;  %v210_v56 = vld [vmem:[#allocation7 + $0x98] sm:$0xff]  ;;  %v141_v60 = vld [vmem:[#allocation5 + $0x80] sm:$0xff] }
  0x38   :  { %v357_v50 = vmul.f32 %v325_v38, %v137_v33  ;;  %v326_v51 = vadd.f32 %v294_v40, %v262_v39  ;;  %v422_v52 = vmul.f32 %v205_v28, %v74_v22  ;;  %v263_v53 = vmul.f32 %v207_v42, %v75_v36  ;;  %v140_v59 = vld [vmem:[#allocation5 + $0x78] sm:$0xff]  ;;  %v79_v63 = vld [vmem:[#allocation2 + $0xa0] sm:$0xff]  ;;  %v80_v4 = vld [vmem:[#allocation2 + $0xa8] sm:$0xff] }
  0x39   :  { %551 = vadd.xlane.f32.xlu0 %v515_v44  ;;  %v516_v57 = vadd.f32 %v484_v45, %v356_v37  ;;  %v485_v58 = vmul.f32 %v453_v46, %v138_v34  ;;  %v295_v61 = vmul.f32 %v208_v43, %v76_v41  ;;  %v391_v62 = vmul.f32 %v208_v43, %v75_v36  ;;  %v211_v5 = vld [vmem:[#allocation7 + $0xa0] sm:$0xff]  ;;  %v212_v6 = vld [vmem:[#allocation7 + $0xa8] sm:$0xff]  ;;  %v143_v10 = vld [vmem:[#allocation5 + $0x90] sm:$0xff] }
  0x3a   :  { %v358_v0 = vmul.f32 %v326_v51, %v139_v47  ;;  %v454_v1 = vsub.f32 %v390_v48, %v422_v52  ;;  %v423_v2 = vmul.f32 %v207_v42, %v76_v41  ;;  %v264_v3 = vmul.f32 %v209_v55, %v77_v49  ;;  %v142_v8 = vld [vmem:[#allocation5 + $0x88] sm:$0xff]  ;;  %v81_v13 = vld [vmem:[#allocation2 + $0xb0] sm:$0xff]  ;;  %v82_v18 = vld [vmem:[#allocation2 + $0xb8] sm:$0xff] }
  0x3b   :  { %553 = vadd.xlane.f32.xlu1 %v516_v57  ;;  %v517_v7 = vadd.f32 %v485_v58, %v357_v50  ;;  %v327_v9 = vadd.f32 %v295_v61, %v263_v53  ;;  %v296_v11 = vmul.f32 %v210_v56, %v78_v54  ;;  %v392_v12 = vmul.f32 %v210_v56, %v77_v49  ;;  %v213_v19 = vld [vmem:[#allocation7 + $0xb0] sm:$0xff]  ;;  %v214_v20 = vld [vmem:[#allocation7 + $0xb8] sm:$0xff]  ;;  %v145_v29 = vld [vmem:[#allocation5 + $0xa0] sm:$0xff] }
  0x3c   :  { %v486_v14 = vmul.f32 %v454_v1, %v140_v59  ;;  %v455_v15 = vsub.f32 %v391_v62, %v423_v2  ;;  %v424_v16 = vmul.f32 %v209_v55, %v78_v54  ;;  %v265_v17 = vmul.f32 %v211_v5, %v79_v63  ;;  %v144_v22 = vld [vmem:[#allocation5 + $0x98] sm:$0xff]  ;;  %v83_v31 = vld [vmem:[#allocation2 + $0xc0] sm:$0xff]  ;;  %v146_v34 = vld [vmem:[#allocation5 + $0xa8] sm:$0xff] }
  0x3d   :  { %555 = vadd.xlane.f32.xlu0 %v517_v7  ;;  %v359_v21 = vmul.f32 %v327_v9, %v141_v60  ;;  %v328_v23 = vadd.f32 %v296_v11, %v264_v3  ;;  %v297_v24 = vmul.f32 %v212_v6, %v80_v4  ;;  %v393_v25 = vmul.f32 %v212_v6, %v79_v63  ;;  %v215_v32 = vld [vmem:[#allocation7 + $0xc0] sm:$0xff]  ;;  %v84_v38 = vld [vmem:[#allocation2 + $0xc8] sm:$0xff]  ;;  %v147_v43 = vld [vmem:[#allocation5 + $0xb0] sm:$0xff] }
  0x3e   :  { %v518_v26 = vadd.f32 %v486_v14, %v358_v0  ;;  %v487_v27 = vmul.f32 %v455_v15, %v142_v8  ;;  %v456_v28 = vsub.f32 %v392_v12, %v424_v16  ;;  %v425_v30 = vmul.f32 %v211_v5, %v80_v4  ;;  %v216_v39 = vld [vmem:[#allocation7 + $0xc8] sm:$0xff]  ;;  %v85_v45 = vld [vmem:[#allocation2 + $0xd0] sm:$0xff]  ;;  %v86_v51 = vld [vmem:[#allocation2 + $0xd8] sm:$0xff] }
  0x3f   :  { %v360_v33 = vmul.f32 %v328_v23, %v143_v10  ;;  %v329_v35 = vadd.f32 %v297_v24, %v265_v17  ;;  %v266_v36 = vmul.f32 %v213_v19, %v81_v13  ;;  %v298_v37 = vmul.f32 %v214_v20, %v82_v18  ;;  %v217_v46 = vld [vmem:[#allocation7 + $0xd0] sm:$0xff]  ;;  %v218_v52 = vld [vmem:[#allocation7 + $0xd8] sm:$0xff]  ;;  %v87_v58 = vld [vmem:[#allocation2 + $0xe0] sm:$0xff] }
  0x40   :  { %557 = vadd.xlane.f32.xlu1 %v518_v26  ;;  %v519_v40 = vadd.f32 %v487_v27, %v359_v21  ;;  %v488_v41 = vmul.f32 %v456_v28, %v144_v22  ;;  %v457_v42 = vsub.f32 %v393_v25, %v425_v30  ;;  %v394_v44 = vmul.f32 %v214_v20, %v81_v13  ;;  %v148_v55 = vld [vmem:[#allocation5 + $0xb8] sm:$0xff]  ;;  %v219_v59 = vld [vmem:[#allocation7 + $0xe0] sm:$0xff]  ;;  %v88_v1 = vld [vmem:[#allocation2 + $0xe8] sm:$0xff] }
  0x41   :  { %v361_v47 = vmul.f32 %v329_v35, %v145_v29  ;;  %v330_v48 = vadd.f32 %v298_v37, %v266_v36  ;;  %v426_v49 = vmul.f32 %v213_v19, %v82_v18  ;;  %v267_v50 = vmul.f32 %v215_v32, %v83_v31  ;;  %v149_v62 = vld [vmem:[#allocation5 + $0xc0] sm:$0xff]  ;;  %v220_v2 = vld [vmem:[#allocation7 + $0xe8] sm:$0xff]  ;;  %v151_v6 = vld [vmem:[#allocation5 + $0xd0] sm:$0xff] }
  0x42   :  { %559 = vadd.xlane.f32.xlu0 %v519_v40  ;;  %v520_v53 = vadd.f32 %v488_v41, %v360_v33  ;;  %v489_v54 = vmul.f32 %v457_v42, %v146_v34  ;;  %v299_v56 = vmul.f32 %v216_v39, %v84_v38  ;;  %v395_v57 = vmul.f32 %v216_v39, %v83_v31  ;;  %v150_v4 = vld [vmem:[#allocation5 + $0xc8] sm:$0xff]  ;;  %v89_v9 = vld [vmem:[#allocation2 + $0xf0] sm:$0xff]  ;;  %v90_v14 = vld [vmem:[#allocation2 + $0xf8] sm:$0xff] }
  0x43   :  { %v362_v60 = vmul.f32 %v330_v48, %v147_v43  ;;  %v458_v61 = vsub.f32 %v394_v44, %v426_v49  ;;  %v427_v63 = vmul.f32 %v215_v32, %v84_v38  ;;  %v268_v0 = vmul.f32 %v217_v46, %v85_v45  ;;  %v221_v15 = vld [vmem:[#allocation7 + $0xf0] sm:$0xff]  ;;  %v222_v16 = vld [vmem:[#allocation7 + $0xf8] sm:$0xff]  ;;  %v153_v25 = vld [vmem:[#allocation5 + $0xe0] sm:$0xff] }
  0x44   :  { %561 = vadd.xlane.f32.xlu1 %v520_v53  ;;  %v521_v3 = vadd.f32 %v489_v54, %v361_v47  ;;  %v331_v5 = vadd.f32 %v299_v56, %v267_v50  ;;  %v300_v7 = vmul.f32 %v218_v52, %v86_v51  ;;  %v396_v8 = vmul.f32 %v218_v52, %v85_v45  ;;  %v152_v18 = vld [vmem:[#allocation5 + $0xd8] sm:$0xff]  ;;  %v91_v27 = vld [vmem:[#allocation2 + $0x100] sm:$0xff]  ;;  %v154_v30 = vld [vmem:[#allocation5 + $0xe8] sm:$0xff] }
  0x45   :  { %v490_v10 = vmul.f32 %v458_v61, %v148_v55  ;;  %v459_v11 = vsub.f32 %v395_v57, %v427_v63  ;;  %v428_v12 = vmul.f32 %v217_v46, %v86_v51  ;;  %v269_v13 = vmul.f32 %v219_v59, %v87_v58  ;;  %v223_v28 = vld [vmem:[#allocation7 + $0x100] sm:$0xff]  ;;  %v92_v34 = vld [vmem:[#allocation2 + $0x108] sm:$0xff]  ;;  %v155_v39 = vld [vmem:[#allocation5 + $0xf0] sm:$0xff] }
  0x46   :  { %563 = vadd.xlane.f32.xlu0 %v521_v3  ;;  %v363_v17 = vmul.f32 %v331_v5, %v149_v62  ;;  %v332_v19 = vadd.f32 %v300_v7, %v268_v0  ;;  %v301_v20 = vmul.f32 %v220_v2, %v88_v1  ;;  %v397_v21 = vmul.f32 %v220_v2, %v87_v58  ;;  %v224_v35 = vld [vmem:[#allocation7 + $0x108] sm:$0xff]  ;;  %v93_v41 = vld [vmem:[#allocation2 + $0x110] sm:$0xff]  ;;  %v94_v47 = vld [vmem:[#allocation2 + $0x118] sm:$0xff] }
  0x47   :  { %v522_v22 = vadd.f32 %v490_v10, %v362_v60  ;;  %v491_v23 = vmul.f32 %v459_v11, %v150_v4  ;;  %v460_v24 = vsub.f32 %v396_v8, %v428_v12  ;;  %v429_v26 = vmul.f32 %v219_v59, %v88_v1  ;;  %v225_v42 = vld [vmem:[#allocation7 + $0x110] sm:$0xff]  ;;  %v226_v48 = vld [vmem:[#allocation7 + $0x118] sm:$0xff]  ;;  %v95_v54 = vld [vmem:[#allocation2 + $0x120] sm:$0xff] }
  0x48   :  { %v364_v29 = vmul.f32 %v332_v19, %v151_v6  ;;  %v333_v31 = vadd.f32 %v301_v20, %v269_v13  ;;  %v270_v32 = vmul.f32 %v221_v15, %v89_v9  ;;  %v302_v33 = vmul.f32 %v222_v16, %v90_v14  ;;  %v156_v51 = vld [vmem:[#allocation5 + $0xf8] sm:$0xff]  ;;  %v227_v55 = vld [vmem:[#allocation7 + $0x120] sm:$0xff]  ;;  %v96_v61 = vld [vmem:[#allocation2 + $0x128] sm:$0xff] }
  0x49   :  { %565 = vadd.xlane.f32.xlu1 %v522_v22  ;;  %v523_v36 = vadd.f32 %v491_v23, %v363_v17  ;;  %v492_v37 = vmul.f32 %v460_v24, %v152_v18  ;;  %v461_v38 = vsub.f32 %v397_v21, %v429_v26  ;;  %v398_v40 = vmul.f32 %v222_v16, %v89_v9  ;;  %v157_v58 = vld [vmem:[#allocation5 + $0x100] sm:$0xff]  ;;  %v228_v62 = vld [vmem:[#allocation7 + $0x128] sm:$0xff]  ;;  %v159_v2 = vld [vmem:[#allocation5 + $0x110] sm:$0xff] }
  0x4a   :  { %v365_v43 = vmul.f32 %v333_v31, %v153_v25  ;;  %v334_v44 = vadd.f32 %v302_v33, %v270_v32  ;;  %v430_v45 = vmul.f32 %v221_v15, %v90_v14  ;;  %v271_v46 = vmul.f32 %v223_v28, %v91_v27  ;;  %v158_v0 = vld [vmem:[#allocation5 + $0x108] sm:$0xff]  ;;  %v97_v5 = vld [vmem:[#allocation2 + $0x130] sm:$0xff]  ;;  %v98_v10 = vld [vmem:[#allocation2 + $0x138] sm:$0xff] }
  0x4b   :  { %567 = vadd.xlane.f32.xlu0 %v523_v36  ;;  %v524_v49 = vadd.f32 %v492_v37, %v364_v29  ;;  %v493_v50 = vmul.f32 %v461_v38, %v154_v30  ;;  %v303_v52 = vmul.f32 %v224_v35, %v92_v34  ;;  %v399_v53 = vmul.f32 %v224_v35, %v91_v27  ;;  %v229_v11 = vld [vmem:[#allocation7 + $0x130] sm:$0xff]  ;;  %v230_v12 = vld [vmem:[#allocation7 + $0x138] sm:$0xff]  ;;  %v161_v21 = vld [vmem:[#allocation5 + $0x120] sm:$0xff] }
  0x4c   :  { %v366_v56 = vmul.f32 %v334_v44, %v155_v39  ;;  %v462_v57 = vsub.f32 %v398_v40, %v430_v45  ;;  %v431_v59 = vmul.f32 %v223_v28, %v92_v34  ;;  %v272_v60 = vmul.f32 %v225_v42, %v93_v41  ;;  %v160_v14 = vld [vmem:[#allocation5 + $0x118] sm:$0xff]  ;;  %v99_v23 = vld [vmem:[#allocation2 + $0x140] sm:$0xff]  ;;  %v162_v26 = vld [vmem:[#allocation5 + $0x128] sm:$0xff] }
  0x4d   :  { %569 = vadd.xlane.f32.xlu1 %v524_v49  ;;  %v525_v63 = vadd.f32 %v493_v50, %v365_v43  ;;  %v335_v1 = vadd.f32 %v303_v52, %v271_v46  ;;  %v304_v3 = vmul.f32 %v226_v48, %v94_v47  ;;  %v400_v4 = vmul.f32 %v226_v48, %v93_v41  ;;  %v231_v24 = vld [vmem:[#allocation7 + $0x140] sm:$0xff]  ;;  %v100_v30 = vld [vmem:[#allocation2 + $0x148] sm:$0xff]  ;;  %v163_v35 = vld [vmem:[#allocation5 + $0x130] sm:$0xff] }
  0x4e   :  { %v494_v6 = vmul.f32 %v462_v57, %v156_v51  ;;  %v463_v7 = vsub.f32 %v399_v53, %v431_v59  ;;  %v432_v8 = vmul.f32 %v225_v42, %v94_v47  ;;  %v273_v9 = vmul.f32 %v227_v55, %v95_v54  ;;  %v232_v31 = vld [vmem:[#allocation7 + $0x148] sm:$0xff]  ;;  %v101_v37 = vld [vmem:[#allocation2 + $0x150] sm:$0xff]  ;;  %v102_v43 = vld [vmem:[#allocation2 + $0x158] sm:$0xff] }
  0x4f   :  { %571 = vadd.xlane.f32.xlu0 %v525_v63  ;;  %v367_v13 = vmul.f32 %v335_v1, %v157_v58  ;;  %v336_v15 = vadd.f32 %v304_v3, %v272_v60  ;;  %v305_v16 = vmul.f32 %v228_v62, %v96_v61  ;;  %v401_v17 = vmul.f32 %v228_v62, %v95_v54  ;;  %v233_v38 = vld [vmem:[#allocation7 + $0x150] sm:$0xff]  ;;  %v234_v44 = vld [vmem:[#allocation7 + $0x158] sm:$0xff]  ;;  %v103_v50 = vld [vmem:[#allocation2 + $0x160] sm:$0xff] }
  0x50   :  { %v526_v18 = vadd.f32 %v494_v6, %v366_v56  ;;  %v495_v19 = vmul.f32 %v463_v7, %v158_v0  ;;  %v464_v20 = vsub.f32 %v400_v4, %v432_v8  ;;  %v433_v22 = vmul.f32 %v227_v55, %v96_v61  ;;  %v164_v47 = vld [vmem:[#allocation5 + $0x138] sm:$0xff]  ;;  %v235_v51 = vld [vmem:[#allocation7 + $0x160] sm:$0xff]  ;;  %v104_v57 = vld [vmem:[#allocation2 + $0x168] sm:$0xff] }
  0x51   :  { %v368_v25 = vmul.f32 %v336_v15, %v159_v2  ;;  %v337_v27 = vadd.f32 %v305_v16, %v273_v9  ;;  %v274_v28 = vmul.f32 %v229_v11, %v97_v5  ;;  %v306_v29 = vmul.f32 %v230_v12, %v98_v10  ;;  %v165_v54 = vld [vmem:[#allocation5 + $0x140] sm:$0xff]  ;;  %v236_v58 = vld [vmem:[#allocation7 + $0x168] sm:$0xff]  ;;  %v167_v62 = vld [vmem:[#allocation5 + $0x150] sm:$0xff] }
  0x52   :  { %573 = vadd.xlane.f32.xlu1 %v526_v18  ;;  %v527_v32 = vadd.f32 %v495_v19, %v367_v13  ;;  %v496_v33 = vmul.f32 %v464_v20, %v160_v14  ;;  %v465_v34 = vsub.f32 %v401_v17, %v433_v22  ;;  %v402_v36 = vmul.f32 %v230_v12, %v97_v5  ;;  %v166_v60 = vld [vmem:[#allocation5 + $0x148] sm:$0xff]  ;;  %v105_v1 = vld [vmem:[#allocation2 + $0x170] sm:$0xff]  ;;  %v106_v6 = vld [vmem:[#allocation2 + $0x178] sm:$0xff] }
  0x53   :  { %v369_v39 = vmul.f32 %v337_v27, %v161_v21  ;;  %v338_v40 = vadd.f32 %v306_v29, %v274_v28  ;;  %v434_v41 = vmul.f32 %v229_v11, %v98_v10  ;;  %v275_v42 = vmul.f32 %v231_v24, %v99_v23  ;;  %v237_v7 = vld [vmem:[#allocation7 + $0x170] sm:$0xff]  ;;  %v238_v8 = vld [vmem:[#allocation7 + $0x178] sm:$0xff]  ;;  %v169_v17 = vld [vmem:[#allocation5 + $0x160] sm:$0xff] }
  0x54   :  { %575 = vadd.xlane.f32.xlu0 %v527_v32  ;;  %v528_v45 = vadd.f32 %v496_v33, %v368_v25  ;;  %v497_v46 = vmul.f32 %v465_v34, %v162_v26  ;;  %v307_v48 = vmul.f32 %v232_v31, %v100_v30  ;;  %v403_v49 = vmul.f32 %v232_v31, %v99_v23  ;;  %v168_v10 = vld [vmem:[#allocation5 + $0x158] sm:$0xff]  ;;  %v107_v19 = vld [vmem:[#allocation2 + $0x180] sm:$0xff]  ;;  %v170_v22 = vld [vmem:[#allocation5 + $0x168] sm:$0xff] }
  0x55   :  { %v370_v52 = vmul.f32 %v338_v40, %v163_v35  ;;  %v466_v53 = vsub.f32 %v402_v36, %v434_v41  ;;  %v435_v55 = vmul.f32 %v231_v24, %v100_v30  ;;  %v276_v56 = vmul.f32 %v233_v38, %v101_v37  ;;  %v239_v20 = vld [vmem:[#allocation7 + $0x180] sm:$0xff]  ;;  %v108_v26 = vld [vmem:[#allocation2 + $0x188] sm:$0xff]  ;;  %v171_v31 = vld [vmem:[#allocation5 + $0x170] sm:$0xff] }
  0x56   :  { %577 = vadd.xlane.f32.xlu1 %v528_v45  ;;  %v529_v59 = vadd.f32 %v497_v46, %v369_v39  ;;  %v339_v61 = vadd.f32 %v307_v48, %v275_v42  ;;  %v308_v63 = vmul.f32 %v234_v44, %v102_v43  ;;  %v404_v0 = vmul.f32 %v234_v44, %v101_v37  ;;  %v240_v27 = vld [vmem:[#allocation7 + $0x188] sm:$0xff]  ;;  %v109_v33 = vld [vmem:[#allocation2 + $0x190] sm:$0xff]  ;;  %v110_v39 = vld [vmem:[#allocation2 + $0x198] sm:$0xff] }
  0x57   :  { %v498_v2 = vmul.f32 %v466_v53, %v164_v47  ;;  %v467_v3 = vsub.f32 %v403_v49, %v435_v55  ;;  %v436_v4 = vmul.f32 %v233_v38, %v102_v43  ;;  %v277_v5 = vmul.f32 %v235_v51, %v103_v50  ;;  %v241_v34 = vld [vmem:[#allocation7 + $0x190] sm:$0xff]  ;;  %v242_v40 = vld [vmem:[#allocation7 + $0x198] sm:$0xff]  ;;  %v111_v46 = vld [vmem:[#allocation2 + $0x1a0] sm:$0xff] }
  0x58   :  { %579 = vadd.xlane.f32.xlu0 %v529_v59  ;;  %v371_v9 = vmul.f32 %v339_v61, %v165_v54  ;;  %v340_v11 = vadd.f32 %v308_v63, %v276_v56  ;;  %v309_v12 = vmul.f32 %v236_v58, %v104_v57  ;;  %v405_v13 = vmul.f32 %v236_v58, %v103_v50  ;;  %v172_v43 = vld [vmem:[#allocation5 + $0x178] sm:$0xff]  ;;  %v243_v47 = vld [vmem:[#allocation7 + $0x1a0] sm:$0xff]  ;;  %v112_v53 = vld [vmem:[#allocation2 + $0x1a8] sm:$0xff] }
  0x59   :  { %v530_v14 = vadd.f32 %v498_v2, %v370_v52  ;;  %v499_v15 = vmul.f32 %v467_v3, %v166_v60  ;;  %v468_v16 = vsub.f32 %v404_v0, %v436_v4  ;;  %v437_v18 = vmul.f32 %v235_v51, %v104_v57  ;;  %v173_v50 = vld [vmem:[#allocation5 + $0x180] sm:$0xff]  ;;  %v244_v54 = vld [vmem:[#allocation7 + $0x1a8] sm:$0xff]  ;;  %v175_v58 = vld [vmem:[#allocation5 + $0x190] sm:$0xff] }
  0x5a   :  { %v372_v21 = vmul.f32 %v340_v11, %v167_v62  ;;  %v341_v23 = vadd.f32 %v309_v12, %v277_v5  ;;  %v278_v24 = vmul.f32 %v237_v7, %v105_v1  ;;  %v310_v25 = vmul.f32 %v238_v8, %v106_v6  ;;  %v174_v56 = vld [vmem:[#allocation5 + $0x188] sm:$0xff]  ;;  %v113_v61 = vld [vmem:[#allocation2 + $0x1b0] sm:$0xff]  ;;  %v114_v2 = vld [vmem:[#allocation2 + $0x1b8] sm:$0xff] }
  0x5b   :  { %581 = vadd.xlane.f32.xlu1 %v530_v14  ;;  %v531_v28 = vadd.f32 %v499_v15, %v371_v9  ;;  %v500_v29 = vmul.f32 %v468_v16, %v168_v10  ;;  %v469_v30 = vsub.f32 %v405_v13, %v437_v18  ;;  %v406_v32 = vmul.f32 %v238_v8, %v105_v1  ;;  %v245_v3 = vld [vmem:[#allocation7 + $0x1b0] sm:$0xff]  ;;  %v246_v4 = vld [vmem:[#allocation7 + $0x1b8] sm:$0xff]  ;;  %v177_v13 = vld [vmem:[#allocation5 + $0x1a0] sm:$0xff] }
  0x5c   :  { %v373_v35 = vmul.f32 %v341_v23, %v169_v17  ;;  %v342_v36 = vadd.f32 %v310_v25, %v278_v24  ;;  %v438_v37 = vmul.f32 %v237_v7, %v106_v6  ;;  %v279_v38 = vmul.f32 %v239_v20, %v107_v19  ;;  %v176_v6 = vld [vmem:[#allocation5 + $0x198] sm:$0xff]  ;;  %v115_v15 = vld [vmem:[#allocation2 + $0x1c0] sm:$0xff]  ;;  %v178_v18 = vld [vmem:[#allocation5 + $0x1a8] sm:$0xff] }
  0x5d   :  { %583 = vadd.xlane.f32.xlu0 %v531_v28  ;;  %v532_v41 = vadd.f32 %v500_v29, %v372_v21  ;;  %v501_v42 = vmul.f32 %v469_v30, %v170_v22  ;;  %v311_v44 = vmul.f32 %v240_v27, %v108_v26  ;;  %v407_v45 = vmul.f32 %v240_v27, %v107_v19  ;;  %v247_v16 = vld [vmem:[#allocation7 + $0x1c0] sm:$0xff]  ;;  %v116_v22 = vld [vmem:[#allocation2 + $0x1c8] sm:$0xff]  ;;  %v179_v27 = vld [vmem:[#allocation5 + $0x1b0] sm:$0xff] }
  0x5e   :  { %v374_v48 = vmul.f32 %v342_v36, %v171_v31  ;;  %v470_v49 = vsub.f32 %v406_v32, %v438_v37  ;;  %v439_v51 = vmul.f32 %v239_v20, %v108_v26  ;;  %v280_v52 = vmul.f32 %v241_v34, %v109_v33  ;;  %v248_v23 = vld [vmem:[#allocation7 + $0x1c8] sm:$0xff]  ;;  %v117_v29 = vld [vmem:[#allocation2 + $0x1d0] sm:$0xff]  ;;  %v250_v36 = vld [vmem:[#allocation7 + $0x1d8] sm:$0xff] }
  0x5f   :  { %585 = vadd.xlane.f32.xlu1 %v532_v41  ;;  %v533_v55 = vadd.f32 %v501_v42, %v373_v35  ;;  %v343_v57 = vadd.f32 %v311_v44, %v279_v38  ;;  %v312_v59 = vmul.f32 %v242_v40, %v110_v39  ;;  %v408_v60 = vmul.f32 %v242_v40, %v109_v33  ;;  %v249_v30 = vld [vmem:[#allocation7 + $0x1d0] sm:$0xff]  ;;  %v118_v35 = vld [vmem:[#allocation2 + $0x1d8] sm:$0xff]  ;;  %v119_v42 = vld [vmem:[#allocation2 + $0x1e0] sm:$0xff] }
  0x60   :  { %v502_v62 = vmul.f32 %v470_v49, %v172_v43  ;;  %v471_v63 = vsub.f32 %v407_v45, %v439_v51  ;;  %v440_v0 = vmul.f32 %v241_v34, %v110_v39  ;;  %v281_v1 = vmul.f32 %v243_v47, %v111_v46  ;;  %v180_v39 = vld [vmem:[#allocation5 + $0x1b8] sm:$0xff]  ;;  %v251_v43 = vld [vmem:[#allocation7 + $0x1e0] sm:$0xff]  ;;  %v120_v49 = vld [vmem:[#allocation2 + $0x1e8] sm:$0xff] }
  0x61   :  { %587 = vadd.xlane.f32.xlu0 %v533_v55  ;;  %v375_v5 = vmul.f32 %v343_v57, %v173_v50  ;;  %v344_v7 = vadd.f32 %v312_v59, %v280_v52  ;;  %v313_v8 = vmul.f32 %v244_v54, %v112_v53  ;;  %v409_v9 = vmul.f32 %v244_v54, %v111_v46  ;;  %v181_v46 = vld [vmem:[#allocation5 + $0x1c0] sm:$0xff]  ;;  %v252_v50 = vld [vmem:[#allocation7 + $0x1e8] sm:$0xff]  ;;  %v183_v54 = vld [vmem:[#allocation5 + $0x1d0] sm:$0xff] }
  0x62   :  { %v534_v10 = vadd.f32 %v502_v62, %v374_v48  ;;  %v503_v11 = vmul.f32 %v471_v63, %v174_v56  ;;  %v472_v12 = vsub.f32 %v408_v60, %v440_v0  ;;  %v441_v14 = vmul.f32 %v243_v47, %v112_v53  ;;  %v182_v52 = vld [vmem:[#allocation5 + $0x1c8] sm:$0xff]  ;;  %v121_v57 = vld [vmem:[#allocation2 + $0x1f0] sm:$0xff]  ;;  %v122_v62 = vld [vmem:[#allocation2 + $0x1f8] sm:$0xff] }
  0x63   :  { %v376_v17 = vmul.f32 %v344_v7, %v175_v58  ;;  %v345_v19 = vadd.f32 %v313_v8, %v281_v1  ;;  %v282_v20 = vmul.f32 %v245_v3, %v113_v61  ;;  %v314_v21 = vmul.f32 %v246_v4, %v114_v2  ;;  %v253_v63 = vld [vmem:[#allocation7 + $0x1f0] sm:$0xff]  ;;  %v254_v0 = vld [vmem:[#allocation7 + $0x1f8] sm:$0xff] }
  0x64   :  { %589 = vadd.xlane.f32.xlu1 %v534_v10  ;;  %v535_v24 = vadd.f32 %v503_v11, %v375_v5  ;;  %v504_v25 = vmul.f32 %v472_v12, %v176_v6  ;;  %v473_v26 = vsub.f32 %v409_v9, %v441_v14  ;;  %v410_v28 = vmul.f32 %v246_v4, %v113_v61  ;;  %v185_v9 = vld [vmem:[#allocation5 + $0x1e0] sm:$0xff]  ;;  %v186_v12 = vld [vmem:[#allocation5 + $0x1e8] sm:$0xff] }
  0x65   :  { %v377_v31 = vmul.f32 %v345_v19, %v177_v13  ;;  %v346_v32 = vadd.f32 %v314_v21, %v282_v20  ;;  %v442_v33 = vmul.f32 %v245_v3, %v114_v2  ;;  %v283_v34 = vmul.f32 %v247_v16, %v115_v15  ;;  %v184_v2 = vld [vmem:[#allocation5 + $0x1d8] sm:$0xff]  ;;  %v187_v19 = vld [vmem:[#allocation5 + $0x1f0] sm:$0xff] }
  0x66   :  { %591 = vadd.xlane.f32.xlu0 %v535_v24  ;;  %v536_v37 = vadd.f32 %v504_v25, %v376_v17  ;;  %v505_v38 = vmul.f32 %v473_v26, %v178_v18  ;;  %v315_v40 = vmul.f32 %v248_v23, %v116_v22  ;;  %v411_v41 = vmul.f32 %v248_v23, %v115_v15  ;;  %v188_v26 = vld [vmem:[#allocation5 + $0x1f8] sm:$0xff] }
  0x67   :  { %v378_v44 = vmul.f32 %v346_v32, %v179_v27  ;;  %v474_v45 = vsub.f32 %v410_v28, %v442_v33  ;;  %v443_v47 = vmul.f32 %v247_v16, %v116_v22  ;;  %v284_v48 = vmul.f32 %v249_v30, %v117_v29 }
  0x68   :  { %593 = vadd.xlane.f32.xlu1 %v536_v37  ;;  %v537_v51 = vadd.f32 %v505_v38, %v377_v31  ;;  %v347_v53 = vadd.f32 %v315_v40, %v283_v34  ;;  %v316_v55 = vmul.f32 %v250_v36, %v118_v35  ;;  %v412_v56 = vmul.f32 %v250_v36, %v117_v29 }
  0x69   :  { %v506_v58 = vmul.f32 %v474_v45, %v180_v39  ;;  %v475_v59 = vsub.f32 %v411_v41, %v443_v47  ;;  %v444_v60 = vmul.f32 %v249_v30, %v118_v35  ;;  %v285_v61 = vmul.f32 %v251_v43, %v119_v42 }
  0x6a   :  { %595 = vadd.xlane.f32.xlu0 %v537_v51  ;;  %v379_v1 = vmul.f32 %v347_v53, %v181_v46  ;;  %v348_v3 = vadd.f32 %v316_v55, %v284_v48  ;;  %v317_v4 = vmul.f32 %v252_v50, %v120_v49  ;;  %v413_v5 = vmul.f32 %v252_v50, %v119_v42 }
  0x6b   :  { %v538_v6 = vadd.f32 %v506_v58, %v378_v44  ;;  %v507_v7 = vmul.f32 %v475_v59, %v182_v52  ;;  %v476_v8 = vsub.f32 %v412_v56, %v444_v60  ;;  %v445_v10 = vmul.f32 %v251_v43, %v120_v49 }
  0x6c   :  { %v380_v11 = vmul.f32 %v348_v3, %v183_v54  ;;  %v349_v13 = vadd.f32 %v317_v4, %v285_v61  ;;  %v286_v14 = vmul.f32 %v253_v63, %v121_v57  ;;  %v318_v15 = vmul.f32 %v254_v0, %v122_v62 }
  0x6d   :  { %597 = vadd.xlane.f32.xlu1 %v538_v6  ;;  %v539_v16 = vadd.f32 %v507_v7, %v379_v1  ;;  %v508_v17 = vmul.f32 %v476_v8, %v184_v2  ;;  %v477_v18 = vsub.f32 %v413_v5, %v445_v10  ;;  %v414_v20 = vmul.f32 %v254_v0, %v121_v57 }
  0x6e   :  { %v381_v21 = vmul.f32 %v349_v13, %v185_v9  ;;  %v350_v22 = vadd.f32 %v318_v15, %v286_v14  ;;  %v446_v23 = vmul.f32 %v253_v63, %v122_v62  ;;  %v3655_v27 = vmov 0  }
  0x6f   :  { %599 = vadd.xlane.f32.xlu0 %v539_v16  ;;  %v540_v24 = vadd.f32 %v508_v17, %v380_v11  ;;  %v509_v25 = vmul.f32 %v477_v18, %v186_v12  ;;  %3563 = vset.pattern.permute.xlu1 %v3655_v27  ;;  %v639_v33 = vlaneseq  ;;  %v3656_v34 = vmov 1966171168  }
  0x70   :  { %v382_v28 = vmul.f32 %v350_v22, %v187_v19  ;;  %v478_v29 = vsub.f32 %v414_v20, %v446_v23  ;;  %3562 = vset.pattern.permute.xlu0 %v3655_v27  ;;  %v1668_v35 = vunpack.c.l.s4 %v3656_v34  ;;  %vm3408_vm10 = vcmask 786112  }
  0x71   :  { %601 = vadd.xlane.f32.xlu1 %v540_v24  ;;  %v541_v30 = vadd.f32 %v509_v25, %v381_v21  ;;  %v3688_v36 = vshrl.u32 %v639_v33, 7  ;;  %vm3415_vm11 = vcmask 851712   ;;  %vm3422_vm12 = vcmask 917312  }
  0x72   :  { %v510_v31 = vmul.f32 %v478_v29, %v188_v26  ;;  %v1669_v37 = vunpack.c.0.s8 %v1668_v35  ;;  %vm3429_vm13 = vcmask 982912   ;;  %vm3436_vm14 = vcmask 1048512  }
  0x73   :  { %603 = vadd.xlane.f32.xlu0 %v541_v30  ;;  %v3691_v38 = vsub.s32 0, %v3688_v36  ;;  %v3694_v39 = vsub.s32 1, %v3688_v36  ;;  %v3697_v40 = vsub.s32 2, %v3688_v36  ;;  %v3700_v41 = vsub.s32 3, %v3688_v36 }
  0x74   :  { %v542_v32 = vadd.f32 %v510_v31, %v382_v28  ;;  %v3703_v42 = vsub.s32 4, %v3688_v36  ;;  %v3706_v43 = vsub.s32 5, %v3688_v36  ;;  %v3709_v44 = vsub.s32 6, %v3688_v36 }
  0x75   :  { %v3712_v45 = vsub.s32 7, %v3688_v36  ;;  %v3715_v47 = vsub.s32 %v1669_v37, %v3688_v36  ;;  %vm3535_vm15 = vcmp.lt.s32.totalorder %v639_v33, 256 }
  0x76   :  { %605 = vadd.xlane.f32.xlu1 %v542_v32 }
  0xb8   :  { %v544_v46 = vpop.xlane.xlu0 %543 }
  0xb9   :  { %v642_v48 = vrot.slane %v544_v46, %v3691_v38  ;;  %v646_v49 = vrot.slane %v544_v46, %v3694_v39  ;;  %v650_v50 = vrot.slane %v544_v46, %v3697_v40  ;;  %v654_v51 = vrot.slane %v544_v46, %v3700_v41 }
  0xba   :  { %v658_v52 = vrot.slane %v544_v46, %v3703_v42  ;;  %v662_v53 = vrot.slane %v544_v46, %v3706_v43  ;;  %v666_v54 = vrot.slane %v544_v46, %v3709_v44  ;;  %v670_v55 = vrot.slane %v544_v46, %v3712_v45 }
  0xbb   :  { %v548_v56 = vpop.xlane.xlu1 %547  ;;  %v1663_v57 = vcombine.low %v642_v48, %v646_v49  ;;  %v1664_v58 = vcombine.low %v650_v50, %v654_v51 }
  0xbc   :  { %v1665_v59 = vcombine.low %v658_v52, %v662_v53  ;;  %v1666_v60 = vcombine.low %v666_v54, %v670_v55  ;;  %v706_v61 = vrot.slane %v548_v56, %v3691_v38  ;;  %v710_v62 = vrot.slane %v548_v56, %v3694_v39 }
  0xbd   :  { %v546_v63 = vpop.xlane.xlu0 %545  ;;  %v1673_v0 = vrot.slane %v1663_v57, %v3715_v47  ;;  %v1680_v1 = vrot.slane %v1664_v58, %v3715_v47  ;;  %v714_v2 = vrot.slane %v548_v56, %v3697_v40  ;;  %v718_v3 = vrot.slane %v548_v56, %v3700_v41 }
  0xbe   :  { %v1687_v4 = vrot.slane %v1665_v59, %v3715_v47  ;;  %v1694_v5 = vrot.slane %v1666_v60, %v3715_v47  ;;  %v674_v6 = vrot.slane %v546_v63, %v3691_v38  ;;  %v678_v7 = vrot.slane %v546_v63, %v3694_v39 }
  0xbf   :  { %v1695_v8 = vcombine.low %v1673_v0, %v1680_v1  ;;  %v682_v9 = vrot.slane %v546_v63, %v3697_v40  ;;  %v686_v10 = vrot.slane %v546_v63, %v3700_v41  ;;  %v690_v11 = vrot.slane %v546_v63, %v3703_v42 }
  0xc0   :  { %v1696_v12 = vcombine.low %v1687_v4, %v1694_v5  ;;  %v694_v13 = vrot.slane %v546_v63, %v3706_v43  ;;  %v698_v14 = vrot.slane %v546_v63, %v3709_v44  ;;  %v702_v15 = vrot.slane %v546_v63, %v3712_v45  ;;  %v550_v24 = vpop.xlane.xlu1 %549 }
  0xc1   :  { %v1703_v16 = vrot.slane %v1695_v8, %v3715_v47  ;;  %v1712_v17 = vcombine.low %v674_v6, %v678_v7  ;;  %v1713_v18 = vcombine.low %v682_v9, %v686_v10  ;;  %v722_v19 = vrot.slane %v548_v56, %v3703_v42 }
  0xc2   :  { %v1710_v20 = vrot.slane %v1696_v12, %v3715_v47  ;;  %v1714_v21 = vcombine.low %v690_v11, %v694_v13  ;;  %v1715_v22 = vcombine.low %v698_v14, %v702_v15  ;;  %v726_v23 = vrot.slane %v548_v56, %v3706_v43  ;;  %v552_v29 = vpop.xlane.xlu0 %551 }
  0xc3   :  { %v1722_v25 = vrot.slane %v1712_v17, %v3715_v47  ;;  %v1729_v26 = vrot.slane %v1713_v18, %v3715_v47  ;;  %v730_v27 = vrot.slane %v548_v56, %v3709_v44  ;;  %v734_v28 = vrot.slane %v548_v56, %v3712_v45 }
  0xc4   :  { %v1711_v30 = vcombine.low %v1703_v16, %v1710_v20  ;;  %v1736_v31 = vrot.slane %v1714_v21, %v3715_v47  ;;  %v1743_v32 = vrot.slane %v1715_v22, %v3715_v47  ;;  %v1761_v34 = vcombine.low %v706_v61, %v710_v62  ;;  %v554_v61 = vpop.xlane.xlu1 %553 }
  0xc5   :  { %v1744_v35 = vcombine.low %v1722_v25, %v1729_v26  ;;  %v1762_v37 = vcombine.low %v714_v2, %v718_v3  ;;  %v1763_v46 = vcombine.low %v722_v19, %v726_v23  ;;  %v1764_v48 = vcombine.low %v730_v27, %v734_v28 }
  0xc6   :  { %3232 = vperm.xlu0 %3562, %v1711_v30   ;;  %v1745_v49 = vcombine.low %v1736_v31, %v1743_v32  ;;  %v1771_v50 = vrot.slane %v1761_v34, %v3715_v47  ;;  %v738_v51 = vrot.slane %v550_v24, %v3691_v38  ;;  %v742_v52 = vrot.slane %v550_v24, %v3694_v39  ;;  %v3764_v2 = vpop.xlane.xlu0 %555 }
  0xc7   :  { %v1752_v53 = vrot.slane %v1744_v35, %v3715_v47  ;;  %v1778_v54 = vrot.slane %v1762_v37, %v3715_v47  ;;  %v1785_v55 = vrot.slane %v1763_v46, %v3715_v47  ;;  %v1792_v56 = vrot.slane %v1764_v48, %v3715_v47 }
  0xc8   :  { %v1759_v57 = vrot.slane %v1745_v49, %v3715_v47  ;;  %v746_v58 = vrot.slane %v550_v24, %v3697_v40  ;;  %v750_v59 = vrot.slane %v550_v24, %v3700_v41  ;;  %v754_v60 = vrot.slane %v550_v24, %v3703_v42 }
  0xc9   :  { %v1793_v62 = vcombine.low %v1771_v50, %v1778_v54  ;;  %v1794_v63 = vcombine.low %v1785_v55, %v1792_v56  ;;  %v758_v0 = vrot.slane %v550_v24, %v3706_v43  ;;  %v762_v1 = vrot.slane %v550_v24, %v3709_v44  ;;  %v3779_v23 = vpop.xlane.xlu1 %557 }
  0xca   :  { %v1760_v3 = vcombine.low %v1752_v53, %v1759_v57  ;;  %v766_v4 = vrot.slane %v550_v24, %v3712_v45  ;;  %v1810_v5 = vcombine.low %v738_v51, %v742_v52  ;;  %v1811_v6 = vcombine.low %v746_v58, %v750_v59 }
  0xcb   :  { %v1801_v7 = vrot.slane %v1793_v62, %v3715_v47  ;;  %v1808_v8 = vrot.slane %v1794_v63, %v3715_v47  ;;  %v1812_v9 = vcombine.low %v754_v60, %v758_v0  ;;  %v770_v10 = vrot.slane %v552_v29, %v3691_v38  ;;  %v3783_v28 = vpop.xlane.xlu0 %559 }
  0xcc   :  { %3235 = vperm.xlu1 %3563, %v1760_v3   ;;  %v1813_v11 = vcombine.low %v762_v1, %v766_v4  ;;  %v1820_v12 = vrot.slane %v1810_v5, %v3715_v47  ;;  %v1827_v13 = vrot.slane %v1811_v6, %v3715_v47  ;;  %v774_v14 = vrot.slane %v552_v29, %v3694_v39 }
  0xcd   :  { %v1809_v15 = vcombine.low %v1801_v7, %v1808_v8  ;;  %v1834_v16 = vrot.slane %v1812_v9, %v3715_v47  ;;  %v778_v17 = vrot.slane %v552_v29, %v3697_v40  ;;  %v782_v18 = vrot.slane %v552_v29, %v3700_v41  ;;  %v562_v60 = vpop.xlane.xlu1 %561 }
  0xce   :  { %v1841_v19 = vrot.slane %v1813_v11, %v3715_v47  ;;  %v1842_v20 = vcombine.low %v1820_v12, %v1827_v13  ;;  %v786_v21 = vrot.slane %v552_v29, %v3703_v42  ;;  %v790_v22 = vrot.slane %v552_v29, %v3706_v43 }
  0xcf   :  { %v794_v24 = vrot.slane %v552_v29, %v3709_v44  ;;  %v798_v25 = vrot.slane %v552_v29, %v3712_v45  ;;  %v1859_v26 = vcombine.low %v770_v10, %v774_v14  ;;  %v1860_v27 = vcombine.low %v778_v17, %v782_v18  ;;  %v3800_v3 = vpop.xlane.xlu0 %563 }
  0xd0   :  { %3238 = vperm.xlu1 %3563, %v1809_v15   ;;  %v1843_v30 = vcombine.low %v1834_v16, %v1841_v19  ;;  %v1850_v31 = vrot.slane %v1842_v20, %v3715_v47  ;;  %v1861_v32 = vcombine.low %v786_v21, %v790_v22  ;;  %v802_v34 = vrot.slane %v554_v61, %v3691_v38 }
  0xd1   :  { %v1862_v35 = vcombine.low %v794_v24, %v798_v25  ;;  %v1869_v37 = vrot.slane %v1859_v26, %v3715_v47  ;;  %v1876_v46 = vrot.slane %v1860_v27, %v3715_v47  ;;  %v806_v48 = vrot.slane %v554_v61, %v3694_v39 }
  0xd2   :  { %v1857_v29 = vrot.slane %v1843_v30, %v3715_v47  ;;  %v1883_v49 = vrot.slane %v1861_v32, %v3715_v47  ;;  %v810_v50 = vrot.slane %v554_v61, %v3697_v40  ;;  %v814_v51 = vrot.slane %v554_v61, %v3700_v41 }
  0xd3   :  { %v1890_v52 = vrot.slane %v1862_v35, %v3715_v47  ;;  %v1891_v53 = vcombine.low %v1869_v37, %v1876_v46  ;;  %v818_v54 = vrot.slane %v554_v61, %v3703_v42  ;;  %v822_v55 = vrot.slane %v554_v61, %v3706_v43 }
  0xd4   :  { %v1858_v56 = vcombine.low %v1850_v31, %v1857_v29  ;;  %v826_v57 = vrot.slane %v554_v61, %v3709_v44  ;;  %v830_v58 = vrot.slane %v554_v61, %v3712_v45  ;;  %v1908_v59 = vcombine.low %v802_v34, %v806_v48  ;;  %v3820_v30 = vpop.xlane.xlu0 %567 }
  0xd5   :  { %v1892_v62 = vcombine.low %v1883_v49, %v1890_v52  ;;  %v1899_v63 = vrot.slane %v1891_v53, %v3715_v47  ;;  %v1909_v0 = vcombine.low %v810_v50, %v814_v51  ;;  %v1910_v1 = vcombine.low %v818_v54, %v822_v55 }
  0xd6   :  { %3241 = vperm.xlu1 %3563, %v1858_v56   ;;  %v1911_v4 = vcombine.low %v826_v57, %v830_v58  ;;  %v1918_v5 = vrot.slane %v1908_v59, %v3715_v47  ;;  %v930_v6 = vrot.slane %v562_v60, %v3691_v38  ;;  %v934_v7 = vrot.slane %v562_v60, %v3694_v39 }
  0xd7   :  { %v1906_v8 = vrot.slane %v1892_v62, %v3715_v47  ;;  %v1925_v61 = vrot.slane %v1909_v0, %v3715_v47  ;;  %v1932_v9 = vrot.slane %v1910_v1, %v3715_v47  ;;  %v938_v10 = vrot.slane %v562_v60, %v3697_v40 }
  0xd8   :  { %v1939_v11 = vrot.slane %v1911_v4, %v3715_v47  ;;  %v942_v12 = vrot.slane %v562_v60, %v3700_v41  ;;  %v946_v13 = vrot.slane %v562_v60, %v3703_v42  ;;  %v950_v14 = vrot.slane %v562_v60, %v3706_v43 }
  0xd9   :  { %v1907_v15 = vcombine.low %v1899_v63, %v1906_v8  ;;  %v1940_v16 = vcombine.low %v1918_v5, %v1925_v61  ;;  %v954_v17 = vrot.slane %v562_v60, %v3709_v44  ;;  %v958_v18 = vrot.slane %v562_v60, %v3712_v45 }
  0xda   :  { %v1941_v19 = vcombine.low %v1932_v9, %v1939_v11  ;;  %v2104_v20 = vcombine.low %v930_v6, %v934_v7  ;;  %v2105_v21 = vcombine.low %v938_v10, %v942_v12  ;;  %v2106_v22 = vcombine.low %v946_v13, %v950_v14 }
  0xdb   :  { %3244 = vperm.xlu1 %3563, %v1907_v15   ;;  %v1948_v24 = vrot.slane %v1940_v16, %v3715_v47  ;;  %v2107_v25 = vcombine.low %v954_v17, %v958_v18  ;;  %v834_v26 = vrot.slane %v3764_v2, %v3691_v38  ;;  %v838_v27 = vrot.slane %v3764_v2, %v3694_v39 }
  0xdc   :  { %v1955_v31 = vrot.slane %v1941_v19, %v3715_v47  ;;  %v2114_v32 = vrot.slane %v2104_v20, %v3715_v47  ;;  %v2121_v34 = vrot.slane %v2105_v21, %v3715_v47  ;;  %v2128_v35 = vrot.slane %v2106_v22, %v3715_v47 }
  0xdd   :  { %v2135_v37 = vrot.slane %v2107_v25, %v3715_v47  ;;  %v842_v46 = vrot.slane %v3764_v2, %v3697_v40  ;;  %v846_v48 = vrot.slane %v3764_v2, %v3700_v41  ;;  %v850_v29 = vrot.slane %v3764_v2, %v3703_v42 }
  0xde   :  { %v1956_v49 = vcombine.low %v1948_v24, %v1955_v31  ;;  %v2136_v50 = vcombine.low %v2114_v32, %v2121_v34  ;;  %v854_v51 = vrot.slane %v3764_v2, %v3706_v43  ;;  %v858_v52 = vrot.slane %v3764_v2, %v3709_v44  ;;  %v3870_v24 = vpop.xlane.xlu1 %565 }
  0xdf   :  { %v2137_v53 = vcombine.low %v2128_v35, %v2135_v37  ;;  %v862_v54 = vrot.slane %v3764_v2, %v3712_v45  ;;  %v1957_v55 = vcombine.low %v834_v26, %v838_v27  ;;  %v1958_v56 = vcombine.low %v842_v46, %v846_v48  ;;  %v3847_v2 = vpop.xlane.xlu0 %571 }
  0xe0   :  { %3247 = vperm.xlu1 %3563, %v1956_v49   ;;  %v2144_v57 = vrot.slane %v2136_v50, %v3715_v47  ;;  %v1959_v58 = vcombine.low %v850_v29, %v854_v51  ;;  %v866_v59 = vrot.slane %v3779_v23, %v3691_v38  ;;  %v870_v60 = vrot.slane %v3779_v23, %v3694_v39 }
  0xe1   :  { %v2151_v62 = vrot.slane %v2137_v53, %v3715_v47  ;;  %v1960_v63 = vcombine.low %v858_v52, %v862_v54  ;;  %v1967_v0 = vrot.slane %v1957_v55, %v3715_v47  ;;  %v1974_v1 = vrot.slane %v1958_v56, %v3715_v47 }
  0xe2   :  { %v1981_v4 = vrot.slane %v1959_v58, %v3715_v47  ;;  %v874_v5 = vrot.slane %v3779_v23, %v3697_v40  ;;  %v878_v6 = vrot.slane %v3779_v23, %v3700_v41  ;;  %v882_v7 = vrot.slane %v3779_v23, %v3703_v42 }
  0xe3   :  { %v2152_v8 = vcombine.low %v2144_v57, %v2151_v62  ;;  %v1988_v61 = vrot.slane %v1960_v63, %v3715_v47  ;;  %v1989_v9 = vcombine.low %v1967_v0, %v1974_v1  ;;  %v886_v10 = vrot.slane %v3779_v23, %v3706_v43  ;;  %v576_v31 = vpop.xlane.xlu0 %575  ;;  %v3895_v62 = vpop.xlane.xlu1 %569 }
  0xe4   :  { %v890_v11 = vrot.slane %v3779_v23, %v3709_v44  ;;  %v894_v12 = vrot.slane %v3779_v23, %v3712_v45  ;;  %v2006_v13 = vcombine.low %v866_v59, %v870_v60  ;;  %v2007_v14 = vcombine.low %v874_v5, %v878_v6 }
  0xe5   :  { %3259 = vperm.xlu0 %3562, %v2152_v8   ;;  %v1990_v15 = vcombine.low %v1981_v4, %v1988_v61  ;;  %v1997_v16 = vrot.slane %v1989_v9, %v3715_v47  ;;  %v2008_v17 = vcombine.low %v882_v7, %v886_v10  ;;  %v898_v18 = vrot.slane %v3783_v28, %v3691_v38 }
  0xe6   :  { %v2009_v19 = vcombine.low %v890_v11, %v894_v12  ;;  %v2016_v20 = vrot.slane %v2006_v13, %v3715_v47  ;;  %v2023_v21 = vrot.slane %v2007_v14, %v3715_v47  ;;  %v902_v22 = vrot.slane %v3783_v28, %v3694_v39 }
  0xe7   :  { %v2004_v23 = vrot.slane %v1990_v15, %v3715_v47  ;;  %v2030_v25 = vrot.slane %v2008_v17, %v3715_v47  ;;  %v906_v26 = vrot.slane %v3783_v28, %v3697_v40  ;;  %v910_v27 = vrot.slane %v3783_v28, %v3700_v41 }
  0xe8   :  { %v2037_v32 = vrot.slane %v2009_v19, %v3715_v47  ;;  %v2038_v34 = vcombine.low %v2016_v20, %v2023_v21  ;;  %v914_v35 = vrot.slane %v3783_v28, %v3703_v42  ;;  %v918_v37 = vrot.slane %v3783_v28, %v3706_v43  ;;  %v580_v20 = vpop.xlane.xlu0 %579 }
  0xe9   :  { %v2005_v46 = vcombine.low %v1997_v16, %v2004_v23  ;;  %v922_v48 = vrot.slane %v3783_v28, %v3709_v44  ;;  %v926_v29 = vrot.slane %v3783_v28, %v3712_v45  ;;  %v2055_v49 = vcombine.low %v898_v18, %v902_v22 }
  0xea   :  { %v2039_v50 = vcombine.low %v2030_v25, %v2037_v32  ;;  %v2046_v51 = vrot.slane %v2038_v34, %v3715_v47  ;;  %v2056_v52 = vcombine.low %v906_v26, %v910_v27  ;;  %v2057_v53 = vcombine.low %v914_v35, %v918_v37  ;;  %v3919_v26 = vpop.xlane.xlu1 %573 }
  0xeb   :  { %3250 = vperm.xlu1 %3563, %v2005_v46   ;;  %v2058_v54 = vcombine.low %v922_v48, %v926_v29  ;;  %v2065_v55 = vrot.slane %v2055_v49, %v3715_v47  ;;  %v1154_v56 = vrot.slane %v576_v31, %v3691_v38  ;;  %v1158_v57 = vrot.slane %v576_v31, %v3694_v39 }
  0xec   :  { %v2053_v58 = vrot.slane %v2039_v50, %v3715_v47  ;;  %v2072_v59 = vrot.slane %v2056_v52, %v3715_v47  ;;  %v2079_v28 = vrot.slane %v2057_v53, %v3715_v47  ;;  %v1162_v60 = vrot.slane %v576_v31, %v3697_v40 }
  0xed   :  { %v2086_v63 = vrot.slane %v2058_v54, %v3715_v47  ;;  %v1166_v0 = vrot.slane %v576_v31, %v3700_v41  ;;  %v1170_v1 = vrot.slane %v576_v31, %v3703_v42  ;;  %v1174_v4 = vrot.slane %v576_v31, %v3706_v43 }
  0xee   :  { %v2054_v5 = vcombine.low %v2046_v51, %v2053_v58  ;;  %v2087_v6 = vcombine.low %v2065_v55, %v2072_v59  ;;  %v1178_v7 = vrot.slane %v576_v31, %v3709_v44  ;;  %v1182_v8 = vrot.slane %v576_v31, %v3712_v45 }
  0xef   :  { %v2088_v61 = vcombine.low %v2079_v28, %v2086_v63  ;;  %v2447_v9 = vcombine.low %v1154_v56, %v1158_v57  ;;  %v2448_v10 = vcombine.low %v1162_v60, %v1166_v0  ;;  %v2449_v11 = vcombine.low %v1170_v1, %v1174_v4  ;;  %v578_v0 = vpop.xlane.xlu1 %577 }
  0xf0   :  { %3253 = vperm.xlu1 %3563, %v2054_v5   ;;  %v2095_v12 = vrot.slane %v2087_v6, %v3715_v47  ;;  %v2450_v13 = vcombine.low %v1178_v7, %v1182_v8  ;;  %v962_v14 = vrot.slane %v3800_v3, %v3691_v38  ;;  %v966_v15 = vrot.slane %v3800_v3, %v3694_v39 }
  0xf1   :  { %v2102_v16 = vrot.slane %v2088_v61, %v3715_v47  ;;  %v2457_v17 = vrot.slane %v2447_v9, %v3715_v47  ;;  %v2464_v18 = vrot.slane %v2448_v10, %v3715_v47  ;;  %v2471_v19 = vrot.slane %v2449_v11, %v3715_v47 }
  0xf2   :  { %v2478_v21 = vrot.slane %v2450_v13, %v3715_v47  ;;  %v970_v22 = vrot.slane %v3800_v3, %v3697_v40  ;;  %v974_v23 = vrot.slane %v3800_v3, %v3700_v41  ;;  %v978_v25 = vrot.slane %v3800_v3, %v3703_v42 }
  0xf3   :  { %v2103_v27 = vcombine.low %v2095_v12, %v2102_v16  ;;  %v2479_v31 = vcombine.low %v2457_v17, %v2464_v18  ;;  %v982_v32 = vrot.slane %v3800_v3, %v3706_v43  ;;  %v986_v34 = vrot.slane %v3800_v3, %v3709_v44  ;;  %v584_v18 = vpop.xlane.xlu0 %583 }
  0xf4   :  { %v2480_v35 = vcombine.low %v2471_v19, %v2478_v21  ;;  %v990_v37 = vrot.slane %v3800_v3, %v3712_v45  ;;  %v2153_v46 = vcombine.low %v962_v14, %v966_v15  ;;  %v2154_v48 = vcombine.low %v970_v22, %v974_v23 }
  0xf5   :  { %3256 = vperm.xlu1 %3563, %v2103_v27   ;;  %v2487_v29 = vrot.slane %v2479_v31, %v3715_v47  ;;  %v2155_v49 = vcombine.low %v978_v25, %v982_v32  ;;  %v1218_v50 = vrot.slane %v580_v20, %v3691_v38  ;;  %v1222_v51 = vrot.slane %v580_v20, %v3694_v39 }
  0xf6   :  { %v2494_v52 = vrot.slane %v2480_v35, %v3715_v47  ;;  %v2156_v53 = vcombine.low %v986_v34, %v990_v37  ;;  %v2163_v54 = vrot.slane %v2153_v46, %v3715_v47  ;;  %v2170_v55 = vrot.slane %v2154_v48, %v3715_v47 }
  0xf7   :  { %v2177_v56 = vrot.slane %v2155_v49, %v3715_v47  ;;  %v1226_v3 = vrot.slane %v580_v20, %v3697_v40  ;;  %v1230_v57 = vrot.slane %v580_v20, %v3700_v41  ;;  %v1234_v58 = vrot.slane %v580_v20, %v3703_v42 }
  0xf8   :  { %v2495_v59 = vcombine.low %v2487_v29, %v2494_v52  ;;  %v2184_v28 = vrot.slane %v2156_v53, %v3715_v47  ;;  %v2185_v60 = vcombine.low %v2163_v54, %v2170_v55  ;;  %v1238_v63 = vrot.slane %v580_v20, %v3706_v43 }
  0xf9   :  { %v1242_v1 = vrot.slane %v580_v20, %v3709_v44  ;;  %v1246_v4 = vrot.slane %v580_v20, %v3712_v45  ;;  %v2545_v5 = vcombine.low %v1218_v50, %v1222_v51  ;;  %v2546_v6 = vcombine.low %v1226_v3, %v1230_v57 }
  0xfa   :  { %3280 = vperm.xlu0 %3562, %v2495_v59   ;;  %v2186_v7 = vcombine.low %v2177_v56, %v2184_v28  ;;  %v2193_v8 = vrot.slane %v2185_v60, %v3715_v47  ;;  %v2547_v61 = vcombine.low %v1234_v58, %v1238_v63  ;;  %v1186_v9 = vrot.slane %v578_v0, %v3691_v38  ;;  %v582_v60 = vpop.xlane.xlu1 %581 }
  0xfb   :  { %v2548_v10 = vcombine.low %v1242_v1, %v1246_v4  ;;  %v2555_v11 = vrot.slane %v2545_v5, %v3715_v47  ;;  %v2562_v12 = vrot.slane %v2546_v6, %v3715_v47  ;;  %v1190_v13 = vrot.slane %v578_v0, %v3694_v39 }
  0xfc   :  { %v2200_v14 = vrot.slane %v2186_v7, %v3715_v47  ;;  %v2569_v15 = vrot.slane %v2547_v61, %v3715_v47  ;;  %v1194_v16 = vrot.slane %v578_v0, %v3697_v40  ;;  %v1198_v17 = vrot.slane %v578_v0, %v3700_v41 }
  0xfd   :  { %v2576_v19 = vrot.slane %v2548_v10, %v3715_v47  ;;  %v2577_v20 = vcombine.low %v2555_v11, %v2562_v12  ;;  %v1202_v21 = vrot.slane %v578_v0, %v3703_v42  ;;  %v1206_v22 = vrot.slane %v578_v0, %v3706_v43  ;;  %v588_v12 = vpop.xlane.xlu0 %587 }
  0xfe   :  { %v2201_v23 = vcombine.low %v2193_v8, %v2200_v14  ;;  %v1210_v25 = vrot.slane %v578_v0, %v3709_v44  ;;  %v1214_v27 = vrot.slane %v578_v0, %v3712_v45  ;;  %v2496_v31 = vcombine.low %v1186_v9, %v1190_v13 }
  0xff   :  { %v2578_v32 = vcombine.low %v2569_v15, %v2576_v19  ;;  %v2585_v34 = vrot.slane %v2577_v20, %v3715_v47  ;;  %v2497_v35 = vcombine.low %v1194_v16, %v1198_v17  ;;  %v2498_v37 = vcombine.low %v1202_v21, %v1206_v22 }
 0x100   :  { %3262 = vperm.xlu1 %3563, %v2201_v23   ;;  %v2499_v46 = vcombine.low %v1210_v25, %v1214_v27  ;;  %v2506_v48 = vrot.slane %v2496_v31, %v3715_v47  ;;  %v1282_v29 = vrot.slane %v584_v18, %v3691_v38  ;;  %v1286_v49 = vrot.slane %v584_v18, %v3694_v39 }
 0x101   :  { %v2592_v50 = vrot.slane %v2578_v32, %v3715_v47  ;;  %v2513_v51 = vrot.slane %v2497_v35, %v3715_v47  ;;  %v2520_v52 = vrot.slane %v2498_v37, %v3715_v47  ;;  %v1290_v53 = vrot.slane %v584_v18, %v3697_v40 }
 0x102   :  { %v2527_v54 = vrot.slane %v2499_v46, %v3715_v47  ;;  %v1294_v55 = vrot.slane %v584_v18, %v3700_v41  ;;  %v1298_v56 = vrot.slane %v584_v18, %v3703_v42  ;;  %v1302_v3 = vrot.slane %v584_v18, %v3706_v43 }
 0x103   :  { %v2593_v57 = vcombine.low %v2585_v34, %v2592_v50  ;;  %v2528_v58 = vcombine.low %v2506_v48, %v2513_v51  ;;  %v1306_v59 = vrot.slane %v584_v18, %v3709_v44  ;;  %v1310_v28 = vrot.slane %v584_v18, %v3712_v45 }
 0x104   :  { %v2529_v63 = vcombine.low %v2520_v52, %v2527_v54  ;;  %v2643_v0 = vcombine.low %v1282_v29, %v1286_v49  ;;  %v2644_v1 = vcombine.low %v1290_v53, %v1294_v55  ;;  %v2645_v4 = vcombine.low %v1298_v56, %v1302_v3  ;;  %v586_v56 = vpop.xlane.xlu1 %585 }
 0x105   :  { %3286 = vperm.xlu0 %3562, %v2593_v57   ;;  %v2536_v5 = vrot.slane %v2528_v58, %v3715_v47  ;;  %v2646_v6 = vcombine.low %v1306_v59, %v1310_v28  ;;  %v1250_v7 = vrot.slane %v582_v60, %v3691_v38  ;;  %v1254_v8 = vrot.slane %v582_v60, %v3694_v39 }
 0x106   :  { %v2543_v61 = vrot.slane %v2529_v63, %v3715_v47  ;;  %v2653_v9 = vrot.slane %v2643_v0, %v3715_v47  ;;  %v2660_v10 = vrot.slane %v2644_v1, %v3715_v47  ;;  %v2667_v11 = vrot.slane %v2645_v4, %v3715_v47 }
 0x107   :  { %v2674_v13 = vrot.slane %v2646_v6, %v3715_v47  ;;  %v1258_v14 = vrot.slane %v582_v60, %v3697_v40  ;;  %v1262_v15 = vrot.slane %v582_v60, %v3700_v41  ;;  %v1266_v16 = vrot.slane %v582_v60, %v3703_v42 }
 0x108   :  { %v2544_v17 = vcombine.low %v2536_v5, %v2543_v61  ;;  %v2675_v18 = vcombine.low %v2653_v9, %v2660_v10  ;;  %v1270_v19 = vrot.slane %v582_v60, %v3706_v43  ;;  %v1274_v20 = vrot.slane %v582_v60, %v3709_v44  ;;  %v592_v10 = vpop.xlane.xlu0 %591 }
 0x109   :  { %v2676_v21 = vcombine.low %v2667_v11, %v2674_v13  ;;  %v1278_v22 = vrot.slane %v582_v60, %v3712_v45  ;;  %v2594_v23 = vcombine.low %v1250_v7, %v1254_v8  ;;  %v2595_v25 = vcombine.low %v1258_v14, %v1262_v15 }
 0x10a   :  { %3283 = vperm.xlu1 %3563, %v2544_v17   ;;  %v2683_v27 = vrot.slane %v2675_v18, %v3715_v47  ;;  %v2596_v31 = vcombine.low %v1266_v16, %v1270_v19  ;;  %v1346_v32 = vrot.slane %v588_v12, %v3691_v38  ;;  %v1350_v34 = vrot.slane %v588_v12, %v3694_v39 }
 0x10b   :  { %v2690_v35 = vrot.slane %v2676_v21, %v3715_v47  ;;  %v2597_v37 = vcombine.low %v1274_v20, %v1278_v22  ;;  %v2604_v46 = vrot.slane %v2594_v23, %v3715_v47  ;;  %v2611_v48 = vrot.slane %v2595_v25, %v3715_v47 }
 0x10c   :  { %v2618_v29 = vrot.slane %v2596_v31, %v3715_v47  ;;  %v1354_v49 = vrot.slane %v588_v12, %v3697_v40  ;;  %v1358_v50 = vrot.slane %v588_v12, %v3700_v41  ;;  %v1362_v51 = vrot.slane %v588_v12, %v3703_v42 }
 0x10d   :  { %v2691_v52 = vcombine.low %v2683_v27, %v2690_v35  ;;  %v2625_v53 = vrot.slane %v2597_v37, %v3715_v47  ;;  %v2626_v54 = vcombine.low %v2604_v46, %v2611_v48  ;;  %v1366_v55 = vrot.slane %v588_v12, %v3706_v43 }
 0x10e   :  { %v1370_v3 = vrot.slane %v588_v12, %v3709_v44  ;;  %v1374_v57 = vrot.slane %v588_v12, %v3712_v45  ;;  %v2741_v58 = vcombine.low %v1346_v32, %v1350_v34  ;;  %v2742_v59 = vcombine.low %v1354_v49, %v1358_v50 }
 0x10f   :  { %3292 = vperm.xlu0 %3562, %v2691_v52   ;;  %v2627_v28 = vcombine.low %v2618_v29, %v2625_v53  ;;  %v2634_v60 = vrot.slane %v2626_v54, %v3715_v47  ;;  %v2743_v63 = vcombine.low %v1362_v51, %v1366_v55  ;;  %v1314_v0 = vrot.slane %v586_v56, %v3691_v38  ;;  %v590_v54 = vpop.xlane.xlu1 %589 }
 0x110   :  { %v2744_v1 = vcombine.low %v1370_v3, %v1374_v57  ;;  %v2751_v4 = vrot.slane %v2741_v58, %v3715_v47  ;;  %v2758_v5 = vrot.slane %v2742_v59, %v3715_v47  ;;  %v1318_v6 = vrot.slane %v586_v56, %v3694_v39 }
 0x111   :  { %v2641_v7 = vrot.slane %v2627_v28, %v3715_v47  ;;  %v2765_v8 = vrot.slane %v2743_v63, %v3715_v47  ;;  %v1322_v61 = vrot.slane %v586_v56, %v3697_v40  ;;  %v1326_v9 = vrot.slane %v586_v56, %v3700_v41 }
 0x112   :  { %v2772_v11 = vrot.slane %v2744_v1, %v3715_v47  ;;  %v2773_v12 = vcombine.low %v2751_v4, %v2758_v5  ;;  %v1330_v13 = vrot.slane %v586_v56, %v3703_v42  ;;  %v1334_v14 = vrot.slane %v586_v56, %v3706_v43  ;;  %v596_v5 = vpop.xlane.xlu0 %595 }
 0x113   :  { %v2642_v15 = vcombine.low %v2634_v60, %v2641_v7  ;;  %v1338_v16 = vrot.slane %v586_v56, %v3709_v44  ;;  %v1342_v17 = vrot.slane %v586_v56, %v3712_v45  ;;  %v2692_v18 = vcombine.low %v1314_v0, %v1318_v6 }
 0x114   :  { %v2774_v19 = vcombine.low %v2765_v8, %v2772_v11  ;;  %v2781_v20 = vrot.slane %v2773_v12, %v3715_v47  ;;  %v2693_v21 = vcombine.low %v1322_v61, %v1326_v9  ;;  %v2694_v22 = vcombine.low %v1330_v13, %v1334_v14 }
 0x115   :  { %3289 = vperm.xlu1 %3563, %v2642_v15   ;;  %v2695_v23 = vcombine.low %v1338_v16, %v1342_v17  ;;  %v2702_v25 = vrot.slane %v2692_v18, %v3715_v47  ;;  %v1410_v27 = vrot.slane %v592_v10, %v3691_v38  ;;  %v1414_v31 = vrot.slane %v592_v10, %v3694_v39 }
 0x116   :  { %v2788_v32 = vrot.slane %v2774_v19, %v3715_v47  ;;  %v2709_v34 = vrot.slane %v2693_v21, %v3715_v47  ;;  %v2716_v35 = vrot.slane %v2694_v22, %v3715_v47  ;;  %v1418_v37 = vrot.slane %v592_v10, %v3697_v40 }
 0x117   :  { %v2723_v46 = vrot.slane %v2695_v23, %v3715_v47  ;;  %v1422_v48 = vrot.slane %v592_v10, %v3700_v41  ;;  %v1426_v29 = vrot.slane %v592_v10, %v3703_v42  ;;  %v1430_v49 = vrot.slane %v592_v10, %v3706_v43 }
 0x118   :  { %v2789_v50 = vcombine.low %v2781_v20, %v2788_v32  ;;  %v2724_v51 = vcombine.low %v2702_v25, %v2709_v34  ;;  %v1434_v52 = vrot.slane %v592_v10, %v3709_v44  ;;  %v1438_v53 = vrot.slane %v592_v10, %v3712_v45 }
 0x119   :  { %v2725_v55 = vcombine.low %v2716_v35, %v2723_v46  ;;  %v2839_v56 = vcombine.low %v1410_v27, %v1414_v31  ;;  %v2840_v3 = vcombine.low %v1418_v37, %v1422_v48  ;;  %v2841_v57 = vcombine.low %v1426_v29, %v1430_v49  ;;  %v594_v27 = vpop.xlane.xlu1 %593 }
 0x11a   :  { %3298 = vperm.xlu0 %3562, %v2789_v50   ;;  %v2732_v58 = vrot.slane %v2724_v51, %v3715_v47  ;;  %v2842_v59 = vcombine.low %v1434_v52, %v1438_v53  ;;  %v1378_v28 = vrot.slane %v590_v54, %v3691_v38  ;;  %v1382_v60 = vrot.slane %v590_v54, %v3694_v39 }
 0x11b   :  { %v2739_v63 = vrot.slane %v2725_v55, %v3715_v47  ;;  %v2849_v0 = vrot.slane %v2839_v56, %v3715_v47  ;;  %v2856_v1 = vrot.slane %v2840_v3, %v3715_v47  ;;  %v2863_v4 = vrot.slane %v2841_v57, %v3715_v47 }
 0x11c   :  { %v2870_v6 = vrot.slane %v2842_v59, %v3715_v47  ;;  %v1386_v7 = vrot.slane %v590_v54, %v3697_v40  ;;  %v1390_v8 = vrot.slane %v590_v54, %v3700_v41  ;;  %v1394_v61 = vrot.slane %v590_v54, %v3703_v42 }
 0x11d   :  { %v2740_v9 = vcombine.low %v2732_v58, %v2739_v63  ;;  %v2871_v10 = vcombine.low %v2849_v0, %v2856_v1  ;;  %v1398_v11 = vrot.slane %v590_v54, %v3706_v43  ;;  %v1402_v12 = vrot.slane %v590_v54, %v3709_v44  ;;  %v598_v1 = vpop.xlane.xlu1 %597 }
 0x11e   :  { %v2872_v13 = vcombine.low %v2863_v4, %v2870_v6  ;;  %v1406_v14 = vrot.slane %v590_v54, %v3712_v45  ;;  %v2790_v15 = vcombine.low %v1378_v28, %v1382_v60  ;;  %v2791_v16 = vcombine.low %v1386_v7, %v1390_v8 }
 0x11f   :  { %3295 = vperm.xlu1 %3563, %v2740_v9   ;;  %v2879_v17 = vrot.slane %v2871_v10, %v3715_v47  ;;  %v2792_v18 = vcombine.low %v1394_v61, %v1398_v11  ;;  %v1474_v19 = vrot.slane %v596_v5, %v3691_v38  ;;  %v1478_v20 = vrot.slane %v596_v5, %v3694_v39 }
 0x120   :  { %v2886_v21 = vrot.slane %v2872_v13, %v3715_v47  ;;  %v2793_v22 = vcombine.low %v1402_v12, %v1406_v14  ;;  %v2800_v23 = vrot.slane %v2790_v15, %v3715_v47  ;;  %v2807_v25 = vrot.slane %v2791_v16, %v3715_v47 }
 0x121   :  { %v2814_v31 = vrot.slane %v2792_v18, %v3715_v47  ;;  %v1482_v32 = vrot.slane %v596_v5, %v3697_v40  ;;  %v1486_v34 = vrot.slane %v596_v5, %v3700_v41  ;;  %v1490_v35 = vrot.slane %v596_v5, %v3703_v42 }
 0x122   :  { %v2887_v37 = vcombine.low %v2879_v17, %v2886_v21  ;;  %v2821_v46 = vrot.slane %v2793_v22, %v3715_v47  ;;  %v2822_v48 = vcombine.low %v2800_v23, %v2807_v25  ;;  %v1494_v29 = vrot.slane %v596_v5, %v3706_v43 }
 0x123   :  { %v1498_v49 = vrot.slane %v596_v5, %v3709_v44  ;;  %v1502_v50 = vrot.slane %v596_v5, %v3712_v45  ;;  %v2937_v51 = vcombine.low %v1474_v19, %v1478_v20  ;;  %v2938_v52 = vcombine.low %v1482_v32, %v1486_v34 }
 0x124   :  { %3304 = vperm.xlu0 %3562, %v2887_v37   ;;  %v2823_v53 = vcombine.low %v2814_v31, %v2821_v46  ;;  %v2830_v54 = vrot.slane %v2822_v48, %v3715_v47  ;;  %v2939_v55 = vcombine.low %v1490_v35, %v1494_v29  ;;  %v1442_v56 = vrot.slane %v594_v27, %v3691_v38 }
 0x125   :  { %v2940_v3 = vcombine.low %v1498_v49, %v1502_v50  ;;  %v2947_v57 = vrot.slane %v2937_v51, %v3715_v47  ;;  %v2954_v58 = vrot.slane %v2938_v52, %v3715_v47  ;;  %v1446_v59 = vrot.slane %v594_v27, %v3694_v39 }
 0x126   :  { %v2837_v28 = vrot.slane %v2823_v53, %v3715_v47  ;;  %v2961_v60 = vrot.slane %v2939_v55, %v3715_v47  ;;  %v1450_v63 = vrot.slane %v594_v27, %v3697_v40  ;;  %v1454_v0 = vrot.slane %v594_v27, %v3700_v41 }
 0x127   :  { %v2968_v4 = vrot.slane %v2940_v3, %v3715_v47  ;;  %v2969_v5 = vcombine.low %v2947_v57, %v2954_v58  ;;  %v1458_v6 = vrot.slane %v594_v27, %v3703_v42  ;;  %v1462_v7 = vrot.slane %v594_v27, %v3706_v43  ;;  %v600_v57 = vpop.xlane.xlu0 %599 }
 0x128   :  { %v2838_v8 = vcombine.low %v2830_v54, %v2837_v28  ;;  %v1466_v61 = vrot.slane %v594_v27, %v3709_v44  ;;  %v1470_v9 = vrot.slane %v594_v27, %v3712_v45  ;;  %v2888_v10 = vcombine.low %v1442_v56, %v1446_v59 }
 0x129   :  { %v2970_v11 = vcombine.low %v2961_v60, %v2968_v4  ;;  %v2977_v12 = vrot.slane %v2969_v5, %v3715_v47  ;;  %v2889_v13 = vcombine.low %v1450_v63, %v1454_v0  ;;  %v2890_v14 = vcombine.low %v1458_v6, %v1462_v7 }
 0x12a   :  { %3301 = vperm.xlu1 %3563, %v2838_v8   ;;  %v2891_v15 = vcombine.low %v1466_v61, %v1470_v9  ;;  %v2898_v16 = vrot.slane %v2888_v10, %v3715_v47  ;;  %v1506_v17 = vrot.slane %v598_v1, %v3691_v38  ;;  %v1510_v18 = vrot.slane %v598_v1, %v3694_v39 }
 0x12b   :  { %v2984_v19 = vrot.slane %v2970_v11, %v3715_v47  ;;  %v2905_v20 = vrot.slane %v2889_v13, %v3715_v47  ;;  %v2912_v21 = vrot.slane %v2890_v14, %v3715_v47  ;;  %v1514_v22 = vrot.slane %v598_v1, %v3697_v40 }
 0x12c   :  { %v2919_v23 = vrot.slane %v2891_v15, %v3715_v47  ;;  %v1518_v25 = vrot.slane %v598_v1, %v3700_v41  ;;  %v1522_v27 = vrot.slane %v598_v1, %v3703_v42  ;;  %v1526_v31 = vrot.slane %v598_v1, %v3706_v43 }
 0x12d   :  { %v2985_v32 = vcombine.low %v2977_v12, %v2984_v19  ;;  %v2920_v34 = vcombine.low %v2898_v16, %v2905_v20  ;;  %v1530_v35 = vrot.slane %v598_v1, %v3709_v44  ;;  %v1534_v37 = vrot.slane %v598_v1, %v3712_v45 }
 0x12e   :  { %v2921_v46 = vcombine.low %v2912_v21, %v2919_v23  ;;  %v2986_v48 = vcombine.low %v1506_v17, %v1510_v18  ;;  %v2987_v29 = vcombine.low %v1514_v22, %v1518_v25  ;;  %v2988_v49 = vcombine.low %v1522_v27, %v1526_v31 }
 0x12f   :  { %3310 = vperm.xlu0 %3562, %v2985_v32   ;;  %v2928_v50 = vrot.slane %v2920_v34, %v3715_v47  ;;  %v2989_v51 = vcombine.low %v1530_v35, %v1534_v37  ;;  %v994_v52 = vrot.slane %v3870_v24, %v3691_v38  ;;  %v998_v53 = vrot.slane %v3870_v24, %v3694_v39 }
 0x130   :  { %v2935_v54 = vrot.slane %v2921_v46, %v3715_v47  ;;  %v2996_v55 = vrot.slane %v2986_v48, %v3715_v47  ;;  %v3003_v56 = vrot.slane %v2987_v29, %v3715_v47  ;;  %v3010_v3 = vrot.slane %v2988_v49, %v3715_v47 }
 0x131   :  { %v3017_v58 = vrot.slane %v2989_v51, %v3715_v47  ;;  %v1002_v59 = vrot.slane %v3870_v24, %v3697_v40  ;;  %v1006_v28 = vrot.slane %v3870_v24, %v3700_v41  ;;  %v1010_v60 = vrot.slane %v3870_v24, %v3703_v42 }
 0x132   :  { %v2936_v63 = vcombine.low %v2928_v50, %v2935_v54  ;;  %v3018_v0 = vcombine.low %v2996_v55, %v3003_v56  ;;  %v1014_v1 = vrot.slane %v3870_v24, %v3706_v43  ;;  %v1018_v4 = vrot.slane %v3870_v24, %v3709_v44  ;;  %v602_v54 = vpop.xlane.xlu1 %601 }
 0x133   :  { %v3019_v5 = vcombine.low %v3010_v3, %v3017_v58  ;;  %v1022_v6 = vrot.slane %v3870_v24, %v3712_v45  ;;  %v2202_v7 = vcombine.low %v994_v52, %v998_v53  ;;  %v2203_v8 = vcombine.low %v1002_v59, %v1006_v28 }
 0x134   :  { %3307 = vperm.xlu1 %3563, %v2936_v63   ;;  %v3026_v61 = vrot.slane %v3018_v0, %v3715_v47  ;;  %v2204_v9 = vcombine.low %v1010_v60, %v1014_v1  ;;  %v1538_v10 = vrot.slane %v600_v57, %v3691_v38  ;;  %v1542_v11 = vrot.slane %v600_v57, %v3694_v39 }
 0x135   :  { %v3033_v12 = vrot.slane %v3019_v5, %v3715_v47  ;;  %v2205_v13 = vcombine.low %v1018_v4, %v1022_v6  ;;  %v2212_v14 = vrot.slane %v2202_v7, %v3715_v47  ;;  %v2219_v15 = vrot.slane %v2203_v8, %v3715_v47 }
 0x136   :  { %v2226_v16 = vrot.slane %v2204_v9, %v3715_v47  ;;  %v1546_v24 = vrot.slane %v600_v57, %v3697_v40  ;;  %v1550_v17 = vrot.slane %v600_v57, %v3700_v41  ;;  %v1554_v18 = vrot.slane %v600_v57, %v3703_v42 }
 0x137   :  { %v3034_v19 = vcombine.low %v3026_v61, %v3033_v12  ;;  %v2233_v20 = vrot.slane %v2205_v13, %v3715_v47  ;;  %v2234_v21 = vcombine.low %v2212_v14, %v2219_v15  ;;  %v1558_v22 = vrot.slane %v600_v57, %v3706_v43 }
 0x138   :  { %v1562_v23 = vrot.slane %v600_v57, %v3709_v44  ;;  %v1566_v25 = vrot.slane %v600_v57, %v3712_v45  ;;  %v3035_v27 = vcombine.low %v1538_v10, %v1542_v11  ;;  %v3036_v31 = vcombine.low %v1546_v24, %v1550_v17 }
 0x139   :  { %3313 = vperm.xlu0 %3562, %v3034_v19   ;;  %v2235_v32 = vcombine.low %v2226_v16, %v2233_v20  ;;  %v2242_v34 = vrot.slane %v2234_v21, %v3715_v47  ;;  %v3037_v35 = vcombine.low %v1554_v18, %v1558_v22  ;;  %v1026_v37 = vrot.slane %v3820_v30, %v3691_v38 }
 0x13a   :  { %v3038_v46 = vcombine.low %v1562_v23, %v1566_v25  ;;  %v3045_v48 = vrot.slane %v3035_v27, %v3715_v47  ;;  %v3052_v29 = vrot.slane %v3036_v31, %v3715_v47  ;;  %v1030_v49 = vrot.slane %v3820_v30, %v3694_v39 }
 0x13b   :  { %v2249_v50 = vrot.slane %v2235_v32, %v3715_v47  ;;  %v3059_v51 = vrot.slane %v3037_v35, %v3715_v47  ;;  %v1034_v52 = vrot.slane %v3820_v30, %v3697_v40  ;;  %v1038_v53 = vrot.slane %v3820_v30, %v3700_v41 }
 0x13c   :  { %v3066_v55 = vrot.slane %v3038_v46, %v3715_v47  ;;  %v3067_v56 = vcombine.low %v3045_v48, %v3052_v29  ;;  %v1042_v3 = vrot.slane %v3820_v30, %v3703_v42  ;;  %v1046_v57 = vrot.slane %v3820_v30, %v3706_v43 }
 0x13d   :  { %v2250_v58 = vcombine.low %v2242_v34, %v2249_v50  ;;  %v1050_v59 = vrot.slane %v3820_v30, %v3709_v44  ;;  %v1054_v28 = vrot.slane %v3820_v30, %v3712_v45  ;;  %v2251_v60 = vcombine.low %v1026_v37, %v1030_v49  ;;  %v604_v37 = vpop.xlane.xlu0 %603 }
 0x13e   :  { %v3068_v63 = vcombine.low %v3059_v51, %v3066_v55  ;;  %v3075_v0 = vrot.slane %v3067_v56, %v3715_v47  ;;  %v2252_v1 = vcombine.low %v1034_v52, %v1038_v53  ;;  %v2253_v4 = vcombine.low %v1042_v3, %v1046_v57 }
 0x13f   :  { %3265 = vperm.xlu1 %3563, %v2250_v58   ;;  %v2254_v5 = vcombine.low %v1050_v59, %v1054_v28  ;;  %v2261_v6 = vrot.slane %v2251_v60, %v3715_v47  ;;  %v1570_v7 = vrot.slane %v602_v54, %v3691_v38  ;;  %v1574_v8 = vrot.slane %v602_v54, %v3694_v39 }
 0x140   :  { %v3082_v61 = vrot.slane %v3068_v63, %v3715_v47  ;;  %v2268_v9 = vrot.slane %v2252_v1, %v3715_v47  ;;  %v2275_v30 = vrot.slane %v2253_v4, %v3715_v47  ;;  %v1578_v10 = vrot.slane %v602_v54, %v3697_v40 }
 0x141   :  { %v2282_v11 = vrot.slane %v2254_v5, %v3715_v47  ;;  %v1582_v12 = vrot.slane %v602_v54, %v3700_v41  ;;  %v1586_v13 = vrot.slane %v602_v54, %v3703_v42  ;;  %v1590_v14 = vrot.slane %v602_v54, %v3706_v43 }
 0x142   :  { %v3083_v15 = vcombine.low %v3075_v0, %v3082_v61  ;;  %v2283_v16 = vcombine.low %v2261_v6, %v2268_v9  ;;  %v1594_v24 = vrot.slane %v602_v54, %v3709_v44  ;;  %v1598_v17 = vrot.slane %v602_v54, %v3712_v45 }
 0x143   :  { %v2284_v18 = vcombine.low %v2275_v30, %v2282_v11  ;;  %v3084_v19 = vcombine.low %v1570_v7, %v1574_v8  ;;  %v3085_v20 = vcombine.low %v1578_v10, %v1582_v12  ;;  %v3086_v21 = vcombine.low %v1586_v13, %v1590_v14 }
 0x144   :  { %3316 = vperm.xlu0 %3562, %v3083_v15   ;;  %v2291_v22 = vrot.slane %v2283_v16, %v3715_v47  ;;  %v3087_v23 = vcombine.low %v1594_v24, %v1598_v17  ;;  %v1058_v25 = vrot.slane %v3895_v62, %v3691_v38  ;;  %v1062_v27 = vrot.slane %v3895_v62, %v3694_v39 }
 0x145   :  { %v2298_v31 = vrot.slane %v2284_v18, %v3715_v47  ;;  %v3094_v32 = vrot.slane %v3084_v19, %v3715_v47  ;;  %v3101_v34 = vrot.slane %v3085_v20, %v3715_v47  ;;  %v3108_v35 = vrot.slane %v3086_v21, %v3715_v47 }
 0x146   :  { %v3115_v46 = vrot.slane %v3087_v23, %v3715_v47  ;;  %v1066_v48 = vrot.slane %v3895_v62, %v3697_v40  ;;  %v1070_v29 = vrot.slane %v3895_v62, %v3700_v41  ;;  %v1074_v49 = vrot.slane %v3895_v62, %v3703_v42 }
 0x147   :  { %v2299_v50 = vcombine.low %v2291_v22, %v2298_v31  ;;  %v3116_v51 = vcombine.low %v3094_v32, %v3101_v34  ;;  %v1078_v52 = vrot.slane %v3895_v62, %v3706_v43  ;;  %v1082_v53 = vrot.slane %v3895_v62, %v3709_v44 }
 0x148   :  { %v3117_v54 = vcombine.low %v3108_v35, %v3115_v46  ;;  %v1086_v55 = vrot.slane %v3895_v62, %v3712_v45  ;;  %v2300_v56 = vcombine.low %v1058_v25, %v1062_v27  ;;  %v2301_v3 = vcombine.low %v1066_v48, %v1070_v29  ;;  %v606_v25 = vpop.xlane.xlu1 %605 }
 0x149   :  { %3268 = vperm.xlu1 %3563, %v2299_v50   ;;  %v3124_v57 = vrot.slane %v3116_v51, %v3715_v47  ;;  %v2302_v58 = vcombine.low %v1074_v49, %v1078_v52  ;;  %v1602_v59 = vrot.slane %v604_v37, %v3691_v38  ;;  %v1606_v28 = vrot.slane %v604_v37, %v3694_v39 }
 0x14a   :  { %v3131_v60 = vrot.slane %v3117_v54, %v3715_v47  ;;  %v2303_v63 = vcombine.low %v1082_v53, %v1086_v55  ;;  %v2310_v0 = vrot.slane %v2300_v56, %v3715_v47  ;;  %v2317_v1 = vrot.slane %v2301_v3, %v3715_v47 }
 0x14b   :  { %v2324_v4 = vrot.slane %v2302_v58, %v3715_v47  ;;  %v1610_v62 = vrot.slane %v604_v37, %v3697_v40  ;;  %v1614_v5 = vrot.slane %v604_v37, %v3700_v41  ;;  %v1618_v6 = vrot.slane %v604_v37, %v3703_v42 }
 0x14c   :  { %v3132_v7 = vcombine.low %v3124_v57, %v3131_v60  ;;  %v2331_v8 = vrot.slane %v2303_v63, %v3715_v47  ;;  %v2332_v61 = vcombine.low %v2310_v0, %v2317_v1  ;;  %v1622_v9 = vrot.slane %v604_v37, %v3706_v43 }
 0x14d   :  { %v1626_v30 = vrot.slane %v604_v37, %v3709_v44  ;;  %v1630_v10 = vrot.slane %v604_v37, %v3712_v45  ;;  %v3133_v11 = vcombine.low %v1602_v59, %v1606_v28  ;;  %v3134_v12 = vcombine.low %v1610_v62, %v1614_v5 }
 0x14e   :  { %3319 = vperm.xlu0 %3562, %v3132_v7   ;;  %v2333_v13 = vcombine.low %v2324_v4, %v2331_v8  ;;  %v2340_v14 = vrot.slane %v2332_v61, %v3715_v47  ;;  %v3135_v15 = vcombine.low %v1618_v6, %v1622_v9  ;;  %v1090_v16 = vrot.slane %v3847_v2, %v3691_v38 }
 0x14f   :  { %v3136_v24 = vcombine.low %v1626_v30, %v1630_v10  ;;  %v3143_v17 = vrot.slane %v3133_v11, %v3715_v47  ;;  %v3150_v18 = vrot.slane %v3134_v12, %v3715_v47  ;;  %v1094_v19 = vrot.slane %v3847_v2, %v3694_v39 }
 0x150   :  { %v2347_v20 = vrot.slane %v2333_v13, %v3715_v47  ;;  %v3157_v21 = vrot.slane %v3135_v15, %v3715_v47  ;;  %v1098_v22 = vrot.slane %v3847_v2, %v3697_v40  ;;  %v1102_v23 = vrot.slane %v3847_v2, %v3700_v41 }
 0x151   :  { %v3164_v27 = vrot.slane %v3136_v24, %v3715_v47  ;;  %v3165_v31 = vcombine.low %v3143_v17, %v3150_v18  ;;  %v1106_v32 = vrot.slane %v3847_v2, %v3703_v42  ;;  %v1110_v34 = vrot.slane %v3847_v2, %v3706_v43 }
 0x152   :  { %v2348_v35 = vcombine.low %v2340_v14, %v2347_v20  ;;  %v1114_v37 = vrot.slane %v3847_v2, %v3709_v44  ;;  %v1118_v46 = vrot.slane %v3847_v2, %v3712_v45  ;;  %v2349_v48 = vcombine.low %v1090_v16, %v1094_v19 }
 0x153   :  { %v3166_v29 = vcombine.low %v3157_v21, %v3164_v27  ;;  %v3173_v49 = vrot.slane %v3165_v31, %v3715_v47  ;;  %v2350_v50 = vcombine.low %v1098_v22, %v1102_v23  ;;  %v2351_v51 = vcombine.low %v1106_v32, %v1110_v34 }
 0x154   :  { %3271 = vperm.xlu1 %3563, %v2348_v35   ;;  %v2352_v52 = vcombine.low %v1114_v37, %v1118_v46  ;;  %v2359_v53 = vrot.slane %v2349_v48, %v3715_v47  ;;  %v1634_v54 = vrot.slane %v606_v25, %v3691_v38  ;;  %v1638_v55 = vrot.slane %v606_v25, %v3694_v39  ;;  %v4255_v37 = vpop.permute.xlu1 %3235 }
 0x155   :  { %v3180_v56 = vrot.slane %v3166_v29, %v3715_v47  ;;  %v2366_v3 = vrot.slane %v2350_v50, %v3715_v47  ;;  %v2373_v2 = vrot.slane %v2351_v51, %v3715_v47  ;;  %v1642_v57 = vrot.slane %v606_v25, %v3697_v40  ;;  %v3233_v51 = vpop.permute.xlu0 %3232 }
 0x156   :  { %v2380_v58 = vrot.slane %v2352_v52, %v3715_v47  ;;  %v1646_v59 = vrot.slane %v606_v25, %v3700_v41  ;;  %v1650_v28 = vrot.slane %v606_v25, %v3703_v42  ;;  %v1654_v60 = vrot.slane %v606_v25, %v3706_v43 }
 0x157   :  { %v3181_v63 = vcombine.low %v3173_v49, %v3180_v56  ;;  %v2381_v0 = vcombine.low %v2359_v53, %v2366_v3  ;;  %v1658_v1 = vrot.slane %v606_v25, %v3709_v44  ;;  %v1662_v4 = vrot.slane %v606_v25, %v3712_v45 }
 0x158   :  { %v2382_v62 = vcombine.low %v2373_v2, %v2380_v58  ;;  %v3182_v5 = vcombine.low %v1634_v54, %v1638_v55  ;;  %v3183_v6 = vcombine.low %v1642_v57, %v1646_v59  ;;  %v3184_v7 = vcombine.low %v1650_v28, %v1654_v60  ;;  %v4257_v46 = vpop.permute.xlu1 %3238 }
 0x159   :  { %3322 = vperm.xlu0 %3562, %v3181_v63   ;;  %v2389_v8 = vrot.slane %v2381_v0, %v3715_v47  ;;  %v3185_v61 = vcombine.low %v1658_v1, %v1662_v4  ;;  %v1122_v9 = vrot.slane %v3919_v26, %v3691_v38  ;;  %v1126_v30 = vrot.slane %v3919_v26, %v3694_v39 }
 0x15a   :  { %v2396_v10 = vrot.slane %v2382_v62, %v3715_v47  ;;  %v3192_v11 = vrot.slane %v3182_v5, %v3715_v47  ;;  %v3199_v12 = vrot.slane %v3183_v6, %v3715_v47  ;;  %v3206_v13 = vrot.slane %v3184_v7, %v3715_v47 }
 0x15b   :  { %v3213_v14 = vrot.slane %v3185_v61, %v3715_v47  ;;  %v1130_v15 = vrot.slane %v3919_v26, %v3697_v40  ;;  %v1134_v16 = vrot.slane %v3919_v26, %v3700_v41  ;;  %v1138_v38 = vrot.slane %v3919_v26, %v3703_v42 }
 0x15c   :  { %v2397_v39 = vcombine.low %v2389_v8, %v2396_v10  ;;  %v3214_v24 = vcombine.low %v3192_v11, %v3199_v12  ;;  %v1142_v17 = vrot.slane %v3919_v26, %v3706_v43  ;;  %v1146_v18 = vrot.slane %v3919_v26, %v3709_v44  ;;  %v4259_v48 = vpop.permute.xlu1 %3241 }
 0x15d   :  { %v3215_v19 = vcombine.low %v3206_v13, %v3213_v14  ;;  %v1150_v20 = vrot.slane %v3919_v26, %v3712_v45  ;;  %v2398_v21 = vcombine.low %v1122_v9, %v1126_v30  ;;  %v2399_v40 = vcombine.low %v1130_v15, %v1134_v16 }
 0x15e   :  { %3274 = vperm.xlu1 %3563, %v2397_v39   ;;  %v3222_v41 = vrot.slane %v3214_v24, %v3715_v47  ;;  %v2400_v22 = vcombine.low %v1138_v38, %v1142_v17  ;;  %v4278_v63 = vand.u32 127, %v639_v33 }
 0x15f   :  { %v3229_v42 = vrot.slane %v3215_v19, %v3715_v47  ;;  %v2401_v23 = vcombine.low %v1146_v18, %v1150_v20  ;;  %v2408_v25 = vrot.slane %v2398_v21, %v3715_v47  ;;  %v2415_v43 = vrot.slane %v2399_v40, %v3715_v47 }
 0x160   :  { %v2422_v27 = vrot.slane %v2400_v22, %v3715_v47  ;;  %v4261_v29 = vpop.permute.xlu1 %3244  ;;  %v4269_v53 = vpop.permute.xlu0 %3259  ;;  %v3333_v1 = vadd.s32 4294967288, %v4278_v63  ;;  %v3347_v5 = vadd.s32 4294967272, %v4278_v63  ;;  %v3340_v6 = vadd.s32 4294967280, %v4278_v63 }
 0x161   :  { %v3230_v44 = vcombine.low %v3222_v41, %v3229_v42  ;;  %v2429_v31 = vrot.slane %v2401_v23, %v3715_v47  ;;  %v2430_v32 = vcombine.low %v2408_v25, %v2415_v43  ;;  %v3331_v8 = vsub.s32 %v4278_v63, %v3688_v36 }
 0x162   :  { %v3336_v62 = vsub.s32 %v3333_v1, %v3688_v36  ;;  %v3350_v30 = vsub.s32 %v3347_v5, %v3688_v36  ;;  %v3361_v10 = vadd.s32 4294967256, %v4278_v63  ;;  %v3343_v12 = vsub.s32 %v3340_v6, %v3688_v36 }
 0x163   :  { %3325 = vperm.xlu0 %3562, %v3230_v44   ;;  %v2431_v45 = vcombine.low %v2422_v27, %v2429_v31  ;;  %v2438_v26 = vrot.slane %v2430_v32, %v3715_v47  ;;  %v3354_v13 = vadd.s32 4294967264, %v4278_v63  ;;  %v3375_v24 = vadd.s32 4294967240, %v4278_v63 }
 0x164   :  { %v4263_v49 = vpop.permute.xlu1 %3247  ;;  %v3364_v39 = vsub.s32 %v3361_v10, %v3688_v36  ;;  %v3368_v18 = vadd.s32 4294967248, %v4278_v63  ;;  %v3337_v21 = vrot.slane %v4255_v37, %v3336_v62  ;;  %v3332_v22 = vrot.slane %v3233_v51, %v3331_v8 }
 0x165   :  { %v2445_v34 = vrot.slane %v2431_v45, %v3715_v47  ;;  %v3357_v17 = vsub.s32 %v3354_v13, %v3688_v36  ;;  %v3344_v42 = vrot.slane %v4257_v46, %v3343_v12  ;;  %v3351_v25 = vrot.slane %v4259_v48, %v3350_v30 }
 0x166   :  { %v3389_v43 = vadd.s32 4294967224, %v4278_v63  ;;  %v3378_v27 = vsub.s32 %v3375_v24, %v3688_v36  ;;  %v3371_v44 = vsub.s32 %v3368_v18, %v3688_v36  ;;  %v3382_v31 = vadd.s32 4294967232, %v4278_v63 }
 0x167   :  { %v2446_v35 = vcombine.low %v2438_v26, %v2445_v34  ;;  %v3339_v26 = vsel %vm3338_vm0, %v3337_v21, %v3332_v22  ;;  %v3358_v46 = vrot.slane %v4261_v29, %v3357_v17  ;;  %v3410_v6 = vadd.s32 4294967200, %v4278_v63 }
 0x168   :  { %v4265_v50 = vpop.permute.xlu1 %3250  ;;  %v3346_v37 = vsel %vm3345_vm1, %v3344_v42, %v3339_v26 }
 0x169   :  { %3277 = vperm.xlu1 %3563, %v2446_v35  }
 0x16c   :  { %v4267_v52 = vpop.permute.xlu1 %3253 }
 0x170   :  { %v4271_v54 = vpop.permute.xlu1 %3256 }
 0x175   :  { %v3281_v55 = vpop.permute.xlu0 %3280 }
 0x176   :  { %v3441_v11 = vrot.slane %v3281_v55, %v3331_v8  ;;  %v3353_v55 = vsel %vm3352_vm2, %v3351_v25, %v3346_v37 }
 0x177   :  { %v3360_v1 = vsel %vm3359_vm3, %v3358_v46, %v3353_v55 }
 0x17b   :  { %v4273_v56 = vpop.permute.xlu1 %3262 }
 0x180   :  { %v3287_v3 = vpop.permute.xlu0 %3286 }
 0x181   :  { %v3450_v16 = vrot.slane %v3287_v3, %v3343_v12  ;;  %v3392_v3 = vsub.s32 %v3389_v43, %v3688_v36 }
 0x183   :  { %v3393_v21 = vrot.slane %v4269_v53, %v3392_v3 }
 0x185   :  { %v3284_v2 = vpop.permute.xlu1 %3283 }
 0x186   :  { %v3445_v61 = vrot.slane %v3284_v2, %v3336_v62  ;;  %v3385_v2 = vsub.s32 %v3382_v31, %v3688_v36  ;;  %v3372_v62 = vrot.slane %v4265_v50, %v3371_v44 }
 0x188   :  { %v3446_v14 = vsel %vm3338_vm0, %v3445_v61, %v3441_v11  ;;  %v3379_v61 = vrot.slane %v4267_v52, %v3378_v27  ;;  %v3424_v11 = vadd.s32 4294967184, %v4278_v63  ;;  %v3431_v52 = vadd.s32 4294967176, %v4278_v63 }
 0x189   :  { %v3451_v19 = vsel %vm3345_vm1, %v3450_v16, %v3446_v14 }
 0x18a   :  { %v3293_v57 = vpop.permute.xlu0 %3292 }
 0x18b   :  { %v3460_v23 = vrot.slane %v3293_v57, %v3357_v17  ;;  %v3396_v57 = vadd.s32 4294967216, %v4278_v63 }
 0x190   :  { %v3290_v58 = vpop.permute.xlu1 %3289 }
 0x191   :  { %v3455_v15 = vrot.slane %v3290_v58, %v3350_v30  ;;  %v3386_v30 = vrot.slane %v4271_v54, %v3385_v2  ;;  %v3413_v54 = vsub.s32 %v3410_v6, %v3688_v36 }
 0x193   :  { %v3456_v40 = vsel %vm3352_vm2, %v3455_v15, %v3451_v19 }
 0x194   :  { %v3461_v32 = vsel %vm3359_vm3, %v3460_v23, %v3456_v40 }
 0x195   :  { %v3299_v59 = vpop.permute.xlu0 %3298 }
 0x196   :  { %v3470_v48 = vrot.slane %v3299_v59, %v3371_v44  ;;  %v3403_v59 = vadd.s32 4294967208, %v4278_v63 }
 0x198   :  { %v3406_v13 = vsub.s32 %v3403_v59, %v3688_v36 }
 0x19a   :  { %v3296_v28 = vpop.permute.xlu1 %3295 }
 0x19b   :  { %v3465_v41 = vrot.slane %v3296_v28, %v3364_v39  ;;  %v3365_v28 = vrot.slane %v4263_v49, %v3364_v39  ;;  %v3417_v49 = vadd.s32 4294967192, %v4278_v63  ;;  %v3427_v63 = vsub.s32 %v3424_v11, %v3688_v36 }
 0x19d   :  { %v3466_v34 = vsel %vm3366_vm4, %v3465_v41, %v3461_v32  ;;  %v3420_v39 = vsub.s32 %v3417_v49, %v3688_v36  ;;  %v3434_v41 = vsub.s32 %v3431_v52, %v3688_v36 }
 0x19e   :  { %v3471_v58 = vsel %vm3373_vm5, %v3470_v48, %v3466_v34 }
 0x19f   :  { %v4275_v60 = vpop.permute.xlu0 %3304 }
 0x1a0   :  { %v3480_v5 = vrot.slane %v4275_v60, %v3385_v2  ;;  %v3367_v60 = vsel %vm3366_vm4, %v3365_v28, %v3360_v1 }
 0x1a1   :  { %v3374_v14 = vsel %vm3373_vm5, %v3372_v62, %v3367_v60 }
 0x1a2   :  { %v3381_v16 = vsel %vm3380_vm6, %v3379_v61, %v3374_v14 }
 0x1a3   :  { %v3388_v24 = vsel %vm3387_vm7, %v3386_v30, %v3381_v16 }
 0x1a5   :  { %v3302_v0 = vpop.permute.xlu1 %3301 }
 0x1a6   :  { %v3475_v35 = vrot.slane %v3302_v0, %v3378_v27 }
 0x1a8   :  { %v3476_v0 = vsel %vm3380_vm6, %v3475_v35, %v3471_v58 }
 0x1a9   :  { %v3481_v10 = vsel %vm3387_vm7, %v3480_v5, %v3476_v0 }
 0x1aa   :  { %v4281_v4 = vpop.permute.xlu0 %3310 }
 0x1af   :  { %v4286_v7 = vpop.permute.xlu1 %3307 }
 0x1b0   :  { %v3485_v29 = vrot.slane %v4286_v7, %v3392_v3  ;;  %v3399_v7 = vsub.s32 %v3396_v57, %v3688_v36 }
 0x1b2   :  { %v3486_v12 = vsel %vm3394_vm8, %v3485_v29, %v3481_v10  ;;  %v3490_v15 = vrot.slane %v4281_v4, %v3399_v7  ;;  %v3400_v17 = vrot.slane %v4273_v56, %v3399_v7  ;;  %v3395_v56 = vsel %vm3394_vm8, %v3393_v21, %v3388_v24 }
 0x1b4   :  { %v4290_v9 = vpop.permute.xlu0 %3313  ;;  %v3491_v18 = vsel %vm3401_vm9, %v3490_v15, %v3486_v12  ;;  %v3402_v53 = vsel %vm3401_vm9, %v3400_v17, %v3395_v56 }
 0x1b5   :  { %v3495_v4 = vrot.slane %v4290_v9, %v3406_v13 }
 0x1b7   :  { %v3496_v25 = vsel %vm3408_vm10, %v3495_v4, %v3491_v18 }
 0x1ba   :  { %v4297_v38 = vpop.permute.xlu1 %3265 }
 0x1bb   :  { %v3407_v40 = vrot.slane %v4297_v38, %v3406_v13 }
 0x1bd   :  { %v3409_v36 = vsel %vm3408_vm10, %v3407_v40, %v3402_v53 }
 0x1bf   :  { %v4304_v20 = vpop.permute.xlu0 %3316 }
 0x1c0   :  { %v3500_v22 = vrot.slane %v4304_v20, %v3413_v54 }
 0x1c2   :  { %v3501_v20 = vsel %vm3415_vm11, %v3500_v22, %v3496_v25 }
 0x1c4   :  { %v4315_v45 = vpop.permute.xlu1 %3268 }
 0x1c5   :  { %v3414_v42 = vrot.slane %v4315_v45, %v3413_v54 }
 0x1c7   :  { %v3416_v31 = vsel %vm3415_vm11, %v3414_v42, %v3409_v36 }
 0x1c9   :  { %v4321_v51 = vpop.permute.xlu0 %3319 }
 0x1ca   :  { %v3505_v43 = vrot.slane %v4321_v51, %v3420_v39 }
 0x1cc   :  { %v3506_v45 = vsel %vm3422_vm12, %v3505_v43, %v3501_v20 }
 0x1cf   :  { %v3272_v8 = vpop.permute.xlu1 %3271 }
 0x1d0   :  { %v3421_v27 = vrot.slane %v3272_v8, %v3420_v39 }
 0x1d2   :  { %v3423_v26 = vsel %vm3422_vm12, %v3421_v27, %v3416_v31 }
 0x1d4   :  { %v3323_v50 = vpop.permute.xlu0 %3322 }
 0x1d5   :  { %v3510_v9 = vrot.slane %v3323_v50, %v3427_v63 }
 0x1d7   :  { %v3511_v35 = vsel %vm3429_vm13, %v3510_v9, %v3506_v45 }
 0x1d9   :  { %v3275_v19 = vpop.permute.xlu1 %3274 }
 0x1da   :  { %v3428_v38 = vrot.slane %v3275_v19, %v3427_v63 }
 0x1dc   :  { %v3430_v37 = vsel %vm3429_vm13, %v3428_v38, %v3423_v26 }
 0x1de   :  { %v3326_v23 = vpop.permute.xlu0 %3325 }
 0x1df   :  { %v3515_v44 = vrot.slane %v3326_v23, %v3434_v41 }
 0x1e1   :  { %v3516_v46 = vsel %vm3436_vm14, %v3515_v44, %v3511_v35 }
 0x1e4   :  { %v3278_v32 = vpop.permute.xlu1 %3277 }
 0x1e5   :  { %v3435_v34 = vrot.slane %v3278_v32, %v3434_v41 }
 0x1e7   :  { %v3437_v48 = vsel %vm3436_vm14, %v3435_v34, %v3430_v37 }
 0x1e8   :  { %v3517_v51 = vcombine.low %v3437_v48, %v3516_v46 }
 0x1ea   :  { %v3524_v55 = vrot.slane %v3517_v51, %v3715_v47 }
 0x1ec   :  { %v3531_v3 = vrot.slane %v3524_v55, %v3715_v47 }
 0x1ee   :  { %3537 = vst.msk [vmem:[#allocation8] sm:$0x3] %vm3535_vm15, %v3531_v3 }
 0x1ef   :  { %3635 = shalt.err (!%p3632_p5)
}
 0x1f0   :  { %3547 = dma.vmem_to_hbm [thread:$0]  %s3545_s2, 32, %s4377_s3, [#allocation4]  }
 0x1f1   :  { %3648 = dma.done.wait [#allocation4], 32  }
 0x1f2   :  { %3649 = vsyncadd [#allocation4], 4294967264 }
 0x1f3   :  { %3551 = vsyncpa [#allocation3], 1 }
 0x1f4   :  { %3552 = vsyncpa [#allocation6], 1 }
 0x1f5   :  { %3553 = vsyncpa [#allocation4], 1 }

</bundles_post_ra>
